<compile_context>
chip_gen: v7x
topology: tpu7x:2x2x1
jax: 0.10.0
libtpu: 0.0.40
codegen_flags: <defaults>
</compile_context>

<pallas_src>
import jax
import jax.numpy as jnp
import numpy as np
from jax.experimental import pallas as pl
from jax.experimental.pallas import tpu as pltpu


# (output parity, padded-window offset) -> transposed-conv kernel index, per spatial axis.
_KIDX = {(0, 0): 3, (0, 1): 1, (1, 1): 2, (1, 2): 0}


# ----------------------------- fused Pallas kernel --------------------------------------

def _make_fused_kernel(B, Ho, Wo, C, ni, nf):
    M = B * Ho * Wo

    def kernel(planes_ref, wd_ref, wu_ref, shift_ref, o_ref, hp_ref):
        # ---- down path: LeakyReLU(0.2) + Conv2d(C -> ni, k=4, s=2, p=1) ----------------
        p = planes_ref[...].astype(jnp.float32)                 # (B, 4, Ho+1, Wo+1, C)
        p = jnp.where(p > 0.0, p, 0.2 * p).astype(jnp.bfloat16)  # LeakyReLU(0.2)

        # im2col lhs built once in VMEM: all 16 taps stacked along the contraction dim.
        cols = []
        for ph in range(2):
            for pw in range(2):
                plane = p[:, 2 * ph + pw]                        # (B, Ho+1, Wo+1, C)
                for dh in range(2):
                    for dw in range(2):
                        cols.append(plane[:, dh:dh + Ho, dw:dw + Wo, :])
        lhs_d = jnp.concatenate(cols, axis=-1).reshape(M, 16 * C)

        h = jnp.dot(lhs_d, wd_ref[...], preferred_element_type=jnp.float32)   # (M, ni)
        h = jnp.maximum(h, 0.0)                                                # ReLU

        # ---- up path: ConvTranspose2d(ni -> nf, k=4, s=2, p=1) + BatchNorm -------------
        # h stays VMEM-resident with a 1-pixel zero halo; only the 4 thin halo strips are
        # (re)zeroed each step (cheap, and correct for any grid->core scheduling).
        zrow = jnp.zeros((B, 1, Wo + 2, ni), jnp.bfloat16)
        zcol = jnp.zeros((B, Ho, 1, ni), jnp.bfloat16)
        hp_ref[:, 0:1, :, :] = zrow
        hp_ref[:, Ho + 1:Ho + 2, :, :] = zrow
        hp_ref[:, 1:Ho + 1, 0:1, :] = zcol
        hp_ref[:, 1:Ho + 1, Wo + 1:Wo + 2, :] = zcol
        hp_ref[:, 1:Ho + 1, 1:Wo + 1, :] = h.astype(jnp.bfloat16).reshape(B, Ho, Wo, ni)

        # All 3x3 shifted windows stacked along the contraction dim -> a single matmul
        # against the zero-padded, BN-scale-folded weight emits the full 4-parity slab.
        wins = [hp_ref[:, r0:r0 + Ho, c0:c0 + Wo, :]
                for r0 in range(3) for c0 in range(3)]
        lhs_u = jnp.concatenate(wins, axis=-1).reshape(M, 9 * ni)

        y = jnp.dot(lhs_u, wu_ref[...], preferred_element_type=jnp.float32)   # (M, 4*nf)
        # BatchNorm scale is folded into wu; only the shift is added here.
        o_ref[...] = (y + shift_ref[...]).reshape(B, Ho, Wo, 4 * nf)

    return kernel


# ----------------------------- forward (glue + kernel) ----------------------------------

def _pick_batch_tile(N, Ho, Wo):
    rows = Ho * Wo
    if rows >= 64:
        return 1                        # enough MXU rows per item; keep a parallel grid axis
    bt = min(N, max(1, 256 // rows))    # fold batch into matmul rows at tiny spatial sizes
    while N % bt:
        bt -= 1
    return bt


def unet_block_forward(x_nchw, params):
    """Innermost UnetBlock forward.  Input/output are NCHW, like the PyTorch module."""
    N, C, H, W = x_nchw.shape
    assert H % 2 == 0 and W % 2 == 0
    Ho, Wo = H // 2, W // 2

    w_down = params["w_down"]                       # (ni, C, 4, 4)   Conv2d weight
    w_up = params["w_up"]                           # (ni, nf, 4, 4)  ConvTranspose2d weight
    ni, nf = w_down.shape[0], w_up.shape[1]

    x32 = x_nchw.astype(jnp.float32)

    # Parity planes of the zero-padded NHWC input (~1x HBM traffic, bf16).
    xpad = jnp.pad(jnp.transpose(x32, (0, 2, 3, 1)), ((0, 0), (1, 1), (1, 1), (0, 0)))
    planes = jnp.stack([xpad[:, 0::2, 0::2, :], xpad[:, 0::2, 1::2, :],
                        xpad[:, 1::2, 0::2, :], xpad[:, 1::2, 1::2, :]],
                       axis=1).astype(jnp.bfloat16)            # (N, 4, Ho+1, Wo+1, C)

    # Down-conv weight restacked to match the in-kernel lhs column order: (16*C, ni).
    wd_rows = [jnp.transpose(w_down[:, :, 2 * dh + ph, 2 * dw + pw], (1, 0))
               for ph in range(2) for pw in range(2)
               for dh in range(2) for dw in range(2)]
    wd = jnp.concatenate(wd_rows, axis=0).astype(jnp.bfloat16)             # (16*C, ni)

    # Up-conv weight (BN scale folded), zero-padded to (9*ni, 4*nf) so one matmul over the
    # 3x3 shifted windows of h emits all four output parities at once.
    eps = 1e-5
    scale = params["gamma"] / jnp.sqrt(params["var"] + eps)                # (nf,)
    shift = params["beta"] - params["mean"] * scale                        # (nf,)
    shift4 = jnp.tile(shift, 4).reshape(1, 4 * nf).astype(jnp.float32)
    w_up_s = w_up * scale[None, :, None, None]
    zero_blk = jnp.zeros((ni, nf), jnp.float32)
    wu_rows = []
    for r0 in range(3):
        for c0 in range(3):
            blks = []
            for ph in range(2):
                for pw in range(2):
                    kh = _KIDX.get((ph, r0))
                    kw = _KIDX.get((pw, c0))
                    blks.append(zero_blk if kh is None or kw is None
                                else w_up_s[:, :, kh, kw])
            wu_rows.append(jnp.concatenate(blks, axis=1))                  # (ni, 4*nf)
    wu = jnp.concatenate(wu_rows, axis=0).astype(jnp.bfloat16)             # (9*ni, 4*nf)

    bt = _pick_batch_tile(N, Ho, Wo)
    kernel = _make_fused_kernel(bt, Ho, Wo, C, ni, nf)
    up_par = pl.pallas_call(
        kernel,
        out_shape=jax.ShapeDtypeStruct((N, Ho, Wo, 4 * nf), jnp.float32),
        grid=(N // bt,),
        in_specs=[
            pl.BlockSpec((bt, 4, Ho + 1, Wo + 1, C), lambda n: (n, 0, 0, 0, 0)),
            pl.BlockSpec((16 * C, ni), lambda n: (0, 0)),
            pl.BlockSpec((9 * ni, 4 * nf), lambda n: (0, 0)),
            pl.BlockSpec((1, 4 * nf), lambda n: (0, 0)),
        ],
        out_specs=pl.BlockSpec((bt, Ho, Wo, 4 * nf), lambda n: (n, 0, 0, 0)),
        scratch_shapes=[pltpu.VMEM((bt, Ho + 2, Wo + 2, ni), jnp.bfloat16)],
        compiler_params=pltpu.CompilerParams(dimension_semantics=("parallel",)),
    )(planes, wd, wu, shift4)

    # De-interleave the parity-planar slab and apply the skip connection straight in NCHW.
    up = up_par.reshape(N, Ho, Wo, 2, 2, nf)                       # (..., ph, pw, c)
    up = jnp.transpose(up, (0, 5, 1, 3, 2, 4)).reshape(N, nf, H, W)
    return jnp.concatenate([x32, up], axis=1)                      # (N, C + nf, H, W)


# ----------------------------- pure-JAX reference ----------------------------------------

def unet_block_reference(x_nchw, params):
    x = jnp.transpose(x_nchw, (0, 2, 3, 1)).astype(jnp.float32)
    h = jnp.where(x > 0, x, 0.2 * x)
    w_down_hwio = jnp.transpose(params["w_down"], (2, 3, 1, 0))
    h = jax.lax.conv_general_dilated(
        h, w_down_hwio, (2, 2), [(1, 1), (1, 1)],
        dimension_numbers=("NHWC", "HWIO", "NHWC"),
        precision=jax.lax.Precision.HIGHEST)
    h = jnp.maximum(h, 0.0)
    w_up_hwio = jnp.transpose(params["w_up"][:, :, ::-1, ::-1], (2, 3, 0, 1))
    h = jax.lax.conv_general_dilated(
        h, w_up_hwio, (1, 1), [(2, 2), (2, 2)], lhs_dilation=(2, 2),
        dimension_numbers=("NHWC", "HWIO", "NHWC"),
        precision=jax.lax.Precision.HIGHEST)
    eps = 1e-5
    scale = params["gamma"] / jnp.sqrt(params["var"] + eps)
    shift = params["beta"] - params["mean"] * scale
    h = h * scale + shift
    out = jnp.concatenate([x, h], axis=-1)
    return jnp.transpose(out, (0, 3, 1, 2))


# ----------------------------- main -------------------------------------------------------

if __name__ == "__main__":
    # Innermost block: UnetBlock(nf=4, ni=8, innermost=True)  => input channels = nf = 4.
    N, C, H, W = 2, 4, 16, 16
    nf, ni = 4, 8

    key = jax.random.PRNGKey(0)
    k_x, k_wd, k_wu, k_g, k_b, k_m, k_v = jax.random.split(key, 7)

    x = jax.random.normal(k_x, (N, C, H, W), jnp.float32)
    params = {
        "w_down": 0.1 * jax.random.normal(k_wd, (ni, C, 4, 4), jnp.float32),   # Conv2d
        "w_up":   0.1 * jax.random.normal(k_wu, (ni, nf, 4, 4), jnp.float32),  # ConvTranspose2d
        "gamma":  jax.random.uniform(k_g, (nf,), jnp.float32, 0.5, 1.5),
        "beta":   0.1 * jax.random.normal(k_b, (nf,), jnp.float32),
        "mean":   0.1 * jax.random.normal(k_m, (nf,), jnp.float32),
        "var":    jax.random.uniform(k_v, (nf,), jnp.float32, 0.5, 1.5),
    }

    out = jax.jit(unet_block_forward)(x, params)
    out = jax.block_until_ready(out)
    assert out.shape == (N, C + nf, H, W), out.shape

    ref = jax.block_until_ready(unet_block_reference(x, params))
    # bf16 matmul operands (f32 accumulation) -> slightly looser tolerance than pure f32.
    np.testing.assert_allclose(np.asarray(out), np.asarray(ref), rtol=2e-2, atol=2e-2)

    print("KERNEL_OK")
</pallas_src>

<mosaic_0001>
module attributes {stable_mosaic.version = 11 : i64} {
  func.func @kernel(%arg0: i32, %arg1: memref<1x4x9x9x4xbf16, #tpu.memory_space<vmem>>, %arg2: memref<64x8xbf16, #tpu.memory_space<vmem>>, %arg3: memref<72x16xbf16, #tpu.memory_space<vmem>>, %arg4: memref<1x16xf32, #tpu.memory_space<vmem>>, %arg5: memref<1x8x8x16xf32, #tpu.memory_space<vmem>>, %arg6: memref<1x10x10x8xbf16, #tpu.memory_space<vmem>>) attributes {dimension_semantics = [#tpu.dimension_semantics<parallel>], iteration_bounds = array<i64: 2>, scalar_prefetch = 0 : i64, scratch_operands = 1 : i64, tpu.core_type = #tpu.core_type<tc>, window_params = [{transform_indices = @transform_0, window_bounds = array<i64: 1, 4, 9, 9, 4>}, {pipeline_mode = #tpu.pipeline_mode<synchronous>, transform_indices = @transform_1, window_bounds = array<i64: 64, 8>}, {pipeline_mode = #tpu.pipeline_mode<synchronous>, transform_indices = @transform_2, window_bounds = array<i64: 72, 16>}, {pipeline_mode = #tpu.pipeline_mode<synchronous>, transform_indices = @transform_3, window_bounds = array<i64: 1, 16>}, {transform_indices = @transform_4, window_bounds = array<i64: 1, 8, 8, 16>}]} {
    %c0 = arith.constant 0 : index
    %c0_0 = arith.constant 0 : index
    %c0_1 = arith.constant 0 : index
    %c0_2 = arith.constant 0 : index
    %c0_3 = arith.constant 0 : index
    %0 = vector.load %arg1[%c0, %c0_0, %c0_1, %c0_2, %c0_3] : memref<1x4x9x9x4xbf16, #tpu.memory_space<vmem>>, vector<1x4x9x9x4xbf16>
    %1 = arith.extf %0 : vector<1x4x9x9x4xbf16> to vector<1x4x9x9x4xf32>
    %cst = arith.constant 0.000000e+00 : f32
    %2 = vector.broadcast %cst : f32 to vector<1x4x9x9x4xf32>
    %3 = arith.cmpf ogt, %1, %2 : vector<1x4x9x9x4xf32>
    %cst_4 = arith.constant 2.000000e-01 : f32
    %4 = vector.broadcast %cst_4 : f32 to vector<1x4x9x9x4xf32>
    %5 = arith.mulf %4, %1 : vector<1x4x9x9x4xf32>
    %6 = arith.select %3, %1, %5 : vector<1x4x9x9x4xi1>, vector<1x4x9x9x4xf32>
    %7 = arith.truncf %6 : vector<1x4x9x9x4xf32> to vector<1x4x9x9x4xbf16>
    %8 = vector.extract_strided_slice %7 {offsets = [0, 0, 0, 0, 0], sizes = [1, 1, 9, 9, 4], strides = [1, 1, 1, 1, 1]} : vector<1x4x9x9x4xbf16> to vector<1x1x9x9x4xbf16>
    %9 = vector.shape_cast %8 : vector<1x1x9x9x4xbf16> to vector<1x9x9x4xbf16>
    %10 = vector.extract_strided_slice %9 {offsets = [0, 0, 0, 0], sizes = [1, 8, 8, 4], strides = [1, 1, 1, 1]} : vector<1x9x9x4xbf16> to vector<1x8x8x4xbf16>
    %11 = vector.extract_strided_slice %9 {offsets = [0, 0, 1, 0], sizes = [1, 8, 8, 4], strides = [1, 1, 1, 1]} : vector<1x9x9x4xbf16> to vector<1x8x8x4xbf16>
    %12 = vector.extract_strided_slice %9 {offsets = [0, 1, 0, 0], sizes = [1, 8, 8, 4], strides = [1, 1, 1, 1]} : vector<1x9x9x4xbf16> to vector<1x8x8x4xbf16>
    %13 = vector.extract_strided_slice %9 {offsets = [0, 1, 1, 0], sizes = [1, 8, 8, 4], strides = [1, 1, 1, 1]} : vector<1x9x9x4xbf16> to vector<1x8x8x4xbf16>
    %14 = vector.extract_strided_slice %7 {offsets = [0, 1, 0, 0, 0], sizes = [1, 1, 9, 9, 4], strides = [1, 1, 1, 1, 1]} : vector<1x4x9x9x4xbf16> to vector<1x1x9x9x4xbf16>
    %15 = vector.shape_cast %14 : vector<1x1x9x9x4xbf16> to vector<1x9x9x4xbf16>
    %16 = vector.extract_strided_slice %15 {offsets = [0, 0, 0, 0], sizes = [1, 8, 8, 4], strides = [1, 1, 1, 1]} : vector<1x9x9x4xbf16> to vector<1x8x8x4xbf16>
    %17 = vector.extract_strided_slice %15 {offsets = [0, 0, 1, 0], sizes = [1, 8, 8, 4], strides = [1, 1, 1, 1]} : vector<1x9x9x4xbf16> to vector<1x8x8x4xbf16>
    %18 = vector.extract_strided_slice %15 {offsets = [0, 1, 0, 0], sizes = [1, 8, 8, 4], strides = [1, 1, 1, 1]} : vector<1x9x9x4xbf16> to vector<1x8x8x4xbf16>
    %19 = vector.extract_strided_slice %15 {offsets = [0, 1, 1, 0], sizes = [1, 8, 8, 4], strides = [1, 1, 1, 1]} : vector<1x9x9x4xbf16> to vector<1x8x8x4xbf16>
    %20 = vector.extract_strided_slice %7 {offsets = [0, 2, 0, 0, 0], sizes = [1, 1, 9, 9, 4], strides = [1, 1, 1, 1, 1]} : vector<1x4x9x9x4xbf16> to vector<1x1x9x9x4xbf16>
    %21 = vector.shape_cast %20 : vector<1x1x9x9x4xbf16> to vector<1x9x9x4xbf16>
    %22 = vector.extract_strided_slice %21 {offsets = [0, 0, 0, 0], sizes = [1, 8, 8, 4], strides = [1, 1, 1, 1]} : vector<1x9x9x4xbf16> to vector<1x8x8x4xbf16>
    %23 = vector.extract_strided_slice %21 {offsets = [0, 0, 1, 0], sizes = [1, 8, 8, 4], strides = [1, 1, 1, 1]} : vector<1x9x9x4xbf16> to vector<1x8x8x4xbf16>
    %24 = vector.extract_strided_slice %21 {offsets = [0, 1, 0, 0], sizes = [1, 8, 8, 4], strides = [1, 1, 1, 1]} : vector<1x9x9x4xbf16> to vector<1x8x8x4xbf16>
    %25 = vector.extract_strided_slice %21 {offsets = [0, 1, 1, 0], sizes = [1, 8, 8, 4], strides = [1, 1, 1, 1]} : vector<1x9x9x4xbf16> to vector<1x8x8x4xbf16>
    %26 = vector.extract_strided_slice %7 {offsets = [0, 3, 0, 0, 0], sizes = [1, 1, 9, 9, 4], strides = [1, 1, 1, 1, 1]} : vector<1x4x9x9x4xbf16> to vector<1x1x9x9x4xbf16>
    %27 = vector.shape_cast %26 : vector<1x1x9x9x4xbf16> to vector<1x9x9x4xbf16>
    %28 = vector.extract_strided_slice %27 {offsets = [0, 0, 0, 0], sizes = [1, 8, 8, 4], strides = [1, 1, 1, 1]} : vector<1x9x9x4xbf16> to vector<1x8x8x4xbf16>
    %29 = vector.extract_strided_slice %27 {offsets = [0, 0, 1, 0], sizes = [1, 8, 8, 4], strides = [1, 1, 1, 1]} : vector<1x9x9x4xbf16> to vector<1x8x8x4xbf16>
    %30 = vector.extract_strided_slice %27 {offsets = [0, 1, 0, 0], sizes = [1, 8, 8, 4], strides = [1, 1, 1, 1]} : vector<1x9x9x4xbf16> to vector<1x8x8x4xbf16>
    %31 = vector.extract_strided_slice %27 {offsets = [0, 1, 1, 0], sizes = [1, 8, 8, 4], strides = [1, 1, 1, 1]} : vector<1x9x9x4xbf16> to vector<1x8x8x4xbf16>
    %32 = tpu.concatenate %10, %11, %12, %13, %16, %17, %18, %19, %22, %23, %24, %25, %28, %29, %30, %31 in 3 : vector<1x8x8x4xbf16>, vector<1x8x8x4xbf16>, vector<1x8x8x4xbf16>, vector<1x8x8x4xbf16>, vector<1x8x8x4xbf16>, vector<1x8x8x4xbf16>, vector<1x8x8x4xbf16>, vector<1x8x8x4xbf16>, vector<1x8x8x4xbf16>, vector<1x8x8x4xbf16>, vector<1x8x8x4xbf16>, vector<1x8x8x4xbf16>, vector<1x8x8x4xbf16>, vector<1x8x8x4xbf16>, vector<1x8x8x4xbf16>, vector<1x8x8x4xbf16> -> vector<1x8x8x64xbf16>
    %33 = vector.shape_cast %32 : vector<1x8x8x64xbf16> to vector<64x64xbf16>
    %c0_5 = arith.constant 0 : index
    %c0_6 = arith.constant 0 : index
    %34 = vector.load %arg2[%c0_5, %c0_6] : memref<64x8xbf16, #tpu.memory_space<vmem>>, vector<64x8xbf16>
    %cst_7 = arith.constant dense<0.000000e+00> : vector<64x8xf32>
    %35 = tpu.matmul %33, %34, %cst_7 {dimension_numbers = #tpu.dot_dimension_numbers<[1], [0], [0], [1], [0, 0, 1, 1], [], []>} : vector<64x64xbf16>, vector<64x8xbf16>, vector<64x8xf32> -> vector<64x8xf32>
    %cst_8 = arith.constant 0.000000e+00 : f32
    %36 = vector.broadcast %cst_8 : f32 to vector<64x8xf32>
    %37 = arith.maximumf %35, %36 : vector<64x8xf32>
    %cst_9 = arith.constant 0.000000e+00 : bf16
    %38 = vector.broadcast %cst_9 : bf16 to vector<1x1x10x8xbf16>
    %cst_10 = arith.constant 0.000000e+00 : bf16
    %39 = vector.broadcast %cst_10 : bf16 to vector<1x8x1x8xbf16>
    %c0_11 = arith.constant 0 : index
    %c0_12 = arith.constant 0 : index
    %c0_13 = arith.constant 0 : index
    %c0_14 = arith.constant 0 : index
    %40 = vector.load %arg6[%c0_11, %c0_12, %c0_13, %c0_14] : memref<1x10x10x8xbf16, #tpu.memory_space<vmem>>, vector<1x1x10x8xbf16>
    tpu.vector_store %arg6[%c0_11, %c0_12, %c0_13, %c0_14], %38 {strides = array<i32>} : memref<1x10x10x8xbf16, #tpu.memory_space<vmem>>, vector<1x1x10x8xbf16>,
    %c0_15 = arith.constant 0 : index
    %c9 = arith.constant 9 : index
    %c0_16 = arith.constant 0 : index
    %c0_17 = arith.constant 0 : index
    %41 = vector.load %arg6[%c0_15, %c9, %c0_16, %c0_17] : memref<1x10x10x8xbf16, #tpu.memory_space<vmem>>, vector<1x1x10x8xbf16>
    tpu.vector_store %arg6[%c0_15, %c9, %c0_16, %c0_17], %38 {strides = array<i32>} : memref<1x10x10x8xbf16, #tpu.memory_space<vmem>>, vector<1x1x10x8xbf16>,
    %c0_18 = arith.constant 0 : index
    %c1 = arith.constant 1 : index
    %c0_19 = arith.constant 0 : index
    %c0_20 = arith.constant 0 : index
    %42 = vector.load %arg6[%c0_18, %c1, %c0_19, %c0_20] : memref<1x10x10x8xbf16, #tpu.memory_space<vmem>>, vector<1x8x1x8xbf16>
    tpu.vector_store %arg6[%c0_18, %c1, %c0_19, %c0_20], %39 {strides = array<i32>} : memref<1x10x10x8xbf16, #tpu.memory_space<vmem>>, vector<1x8x1x8xbf16>,
    %c0_21 = arith.constant 0 : index
    %c1_22 = arith.constant 1 : index
    %c9_23 = arith.constant 9 : index
    %c0_24 = arith.constant 0 : index
    %43 = vector.load %arg6[%c0_21, %c1_22, %c9_23, %c0_24] : memref<1x10x10x8xbf16, #tpu.memory_space<vmem>>, vector<1x8x1x8xbf16>
    tpu.vector_store %arg6[%c0_21, %c1_22, %c9_23, %c0_24], %39 {strides = array<i32>} : memref<1x10x10x8xbf16, #tpu.memory_space<vmem>>, vector<1x8x1x8xbf16>,
    %44 = arith.truncf %37 : vector<64x8xf32> to vector<64x8xbf16>
    %45 = vector.shape_cast %44 : vector<64x8xbf16> to vector<1x8x8x8xbf16>
    %c0_25 = arith.constant 0 : index
    %c1_26 = arith.constant 1 : index
    %c1_27 = arith.constant 1 : index
    %c0_28 = arith.constant 0 : index
    %46 = vector.load %arg6[%c0_25, %c1_26, %c1_27, %c0_28] : memref<1x10x10x8xbf16, #tpu.memory_space<vmem>>, vector<1x8x8x8xbf16>
    tpu.vector_store %arg6[%c0_25, %c1_26, %c1_27, %c0_28], %45 {strides = array<i32>} : memref<1x10x10x8xbf16, #tpu.memory_space<vmem>>, vector<1x8x8x8xbf16>,
    %c0_29 = arith.constant 0 : index
    %c0_30 = arith.constant 0 : index
    %c0_31 = arith.constant 0 : index
    %c0_32 = arith.constant 0 : index
    %47 = vector.load %arg6[%c0_29, %c0_30, %c0_31, %c0_32] : memref<1x10x10x8xbf16, #tpu.memory_space<vmem>>, vector<1x8x8x8xbf16>
    %c0_33 = arith.constant 0 : index
    %c0_34 = arith.constant 0 : index
    %c1_35 = arith.constant 1 : index
    %c0_36 = arith.constant 0 : index
    %48 = vector.load %arg6[%c0_33, %c0_34, %c1_35, %c0_36] : memref<1x10x10x8xbf16, #tpu.memory_space<vmem>>, vector<1x8x8x8xbf16>
    %c0_37 = arith.constant 0 : index
    %c0_38 = arith.constant 0 : index
    %c2 = arith.constant 2 : index
    %c0_39 = arith.constant 0 : index
    %49 = vector.load %arg6[%c0_37, %c0_38, %c2, %c0_39] : memref<1x10x10x8xbf16, #tpu.memory_space<vmem>>, vector<1x8x8x8xbf16>
    %c0_40 = arith.constant 0 : index
    %c1_41 = arith.constant 1 : index
    %c0_42 = arith.constant 0 : index
    %c0_43 = arith.constant 0 : index
    %50 = vector.load %arg6[%c0_40, %c1_41, %c0_42, %c0_43] : memref<1x10x10x8xbf16, #tpu.memory_space<vmem>>, vector<1x8x8x8xbf16>
    %c0_44 = arith.constant 0 : index
    %c1_45 = arith.constant 1 : index
    %c1_46 = arith.constant 1 : index
    %c0_47 = arith.constant 0 : index
    %51 = vector.load %arg6[%c0_44, %c1_45, %c1_46, %c0_47] : memref<1x10x10x8xbf16, #tpu.memory_space<vmem>>, vector<1x8x8x8xbf16>
    %c0_48 = arith.constant 0 : index
    %c1_49 = arith.constant 1 : index
    %c2_50 = arith.constant 2 : index
    %c0_51 = arith.constant 0 : index
    %52 = vector.load %arg6[%c0_48, %c1_49, %c2_50, %c0_51] : memref<1x10x10x8xbf16, #tpu.memory_space<vmem>>, vector<1x8x8x8xbf16>
    %c0_52 = arith.constant 0 : index
    %c2_53 = arith.constant 2 : index
    %c0_54 = arith.constant 0 : index
    %c0_55 = arith.constant 0 : index
    %53 = vector.load %arg6[%c0_52, %c2_53, %c0_54, %c0_55] : memref<1x10x10x8xbf16, #tpu.memory_space<vmem>>, vector<1x8x8x8xbf16>
    %c0_56 = arith.constant 0 : index
    %c2_57 = arith.constant 2 : index
    %c1_58 = arith.constant 1 : index
    %c0_59 = arith.constant 0 : index
    %54 = vector.load %arg6[%c0_56, %c2_57, %c1_58, %c0_59] : memref<1x10x10x8xbf16, #tpu.memory_space<vmem>>, vector<1x8x8x8xbf16>
    %c0_60 = arith.constant 0 : index
    %c2_61 = arith.constant 2 : index
    %c2_62 = arith.constant 2 : index
    %c0_63 = arith.constant 0 : index
    %55 = vector.load %arg6[%c0_60, %c2_61, %c2_62, %c0_63] : memref<1x10x10x8xbf16, #tpu.memory_space<vmem>>, vector<1x8x8x8xbf16>
    %56 = tpu.concatenate %47, %48, %49, %50, %51, %52, %53, %54, %55 in 3 : vector<1x8x8x8xbf16>, vector<1x8x8x8xbf16>, vector<1x8x8x8xbf16>, vector<1x8x8x8xbf16>, vector<1x8x8x8xbf16>, vector<1x8x8x8xbf16>, vector<1x8x8x8xbf16>, vector<1x8x8x8xbf16>, vector<1x8x8x8xbf16> -> vector<1x8x8x72xbf16>
    %57 = vector.shape_cast %56 : vector<1x8x8x72xbf16> to vector<64x72xbf16>
    %c0_64 = arith.constant 0 : index
    %c0_65 = arith.constant 0 : index
    %58 = vector.load %arg3[%c0_64, %c0_65] : memref<72x16xbf16, #tpu.memory_space<vmem>>, vector<72x16xbf16>
    %cst_66 = arith.constant dense<0.000000e+00> : vector<64x16xf32>
    %59 = tpu.matmul %57, %58, %cst_66 {dimension_numbers = #tpu.dot_dimension_numbers<[1], [0], [0], [1], [0, 0, 1, 1], [], []>} : vector<64x72xbf16>, vector<72x16xbf16>, vector<64x16xf32> -> vector<64x16xf32>
    %c0_67 = arith.constant 0 : index
    %c0_68 = arith.constant 0 : index
    %60 = vector.load %arg4[%c0_67, %c0_68] : memref<1x16xf32, #tpu.memory_space<vmem>>, vector<1x16xf32>
    %61 = vector.broadcast %60 : vector<1x16xf32> to vector<64x16xf32>
    %62 = arith.addf %59, %61 : vector<64x16xf32>
    %63 = vector.shape_cast %62 : vector<64x16xf32> to vector<1x8x8x16xf32>
    %c0_69 = arith.constant 0 : index
    %c0_70 = arith.constant 0 : index
    %c0_71 = arith.constant 0 : index
    %c0_72 = arith.constant 0 : index
    %64 = vector.load %arg5[%c0_69, %c0_70, %c0_71, %c0_72] : memref<1x8x8x16xf32, #tpu.memory_space<vmem>>, vector<1x8x8x16xf32>
    tpu.vector_store %arg5[%c0_69, %c0_70, %c0_71, %c0_72], %63 {strides = array<i32>} : memref<1x8x8x16xf32, #tpu.memory_space<vmem>>, vector<1x8x8x16xf32>,
    return
  }
  func.func @transform_0(%arg0: i32) -> (i32, i32, i32, i32, i32) {
    %c0_i32 = arith.constant 0 : i32
    %c0_i32_0 = arith.constant 0 : i32
    %c0_i32_1 = arith.constant 0 : i32
    %c0_i32_2 = arith.constant 0 : i32
    %c0_i32_3 = arith.constant 0 : i32
    return %arg0, %c0_i32, %c0_i32_0, %c0_i32_1, %c0_i32_2 : i32, i32, i32, i32, i32
  }
  func.func @transform_1(%arg0: i32) -> (i32, i32) {
    %c0_i32 = arith.constant 0 : i32
    %c0_i32_0 = arith.constant 0 : i32
    %c0_i32_1 = arith.constant 0 : i32
    return %c0_i32, %c0_i32_0 : i32, i32
  }
  func.func @transform_2(%arg0: i32) -> (i32, i32) {
    %c0_i32 = arith.constant 0 : i32
    %c0_i32_0 = arith.constant 0 : i32
    %c0_i32_1 = arith.constant 0 : i32
    return %c0_i32, %c0_i32_0 : i32, i32
  }
  func.func @transform_3(%arg0: i32) -> (i32, i32) {
    %c0_i32 = arith.constant 0 : i32
    %c0_i32_0 = arith.constant 0 : i32
    %c0_i32_1 = arith.constant 0 : i32
    return %c0_i32, %c0_i32_0 : i32, i32
  }
  func.func @transform_4(%arg0: i32) -> (i32, i32, i32, i32) {
    %c0_i32 = arith.constant 0 : i32
    %c0_i32_0 = arith.constant 0 : i32
    %c0_i32_1 = arith.constant 0 : i32
    %c0_i32_2 = arith.constant 0 : i32
    return %arg0, %c0_i32, %c0_i32_0, %c0_i32_1 : i32, i32, i32, i32
  }
}

</mosaic_0001>

<bundles_post_ra>
// kernel: tile.8
= control target key start
LH: loop header
LB: loop body
LE: loop exit
PB: predicated region body
PF: predicated region fallthrough
CT: control target
= control target key end

     0   :  { %s22_s0 = inlined_call_operand.vmem [shape: f32[4], index: 0, kind: input, shape index: {}]   ;;  %s23_s1 = inlined_call_operand.vmem [shape: f32[4,4], index: 1, kind: output, shape index: {}]  }
   0x1   :  { %v4_v0 = vld [vmem:[%s22_s0] ss:$0 sm:$0xff] }
   0x2   :  { %5 = vst [vmem:[%s23_s1] sm:$0xf] %v4_v0 }

// kernel: tile.9
= control target key start
LH: loop header
LB: loop body
LE: loop exit
PB: predicated region body
PF: predicated region fallthrough
CT: control target
= control target key end

     0   :  { %vm7_vm0 = vcmask 31744   ;;  %s37_s8 = smov 4   ;;  %s38_s9 = smov 8   ;;  %vm13_vm1 = vcmask 130144   ;;  %vm19_vm2 = vcmask 97344   ;;  %vm25_vm3 = vcmask 64544   ;;  %s55_s0 = inlined_call_operand.vmem [shape: f32[4,4], index: 0, kind: input, shape index: {}]   ;;  %s56_s1 = inlined_call_operand.vmem [shape: f32[1,16], index: 1, kind: output, shape index: {}]  }
   0x1   :  { %v4_v0 = vld [vmem:[%s55_s0] sm:$0xf]  ;;  %s36_s0 = smov 12  }
   0x2   :  { %5 = vst [vmem:[#allocation1] sm:$0xf] %v4_v0 }
   0x9   :  { %v10_v1 = vld [vmem:[#allocation1 + $0x3] sm:$0x1]   ;;  %v22_v2 = vld [vmem:[#allocation1 + $0x1] sm:$0x1]   ;;  %v6_v3 = vld [vmem:[#allocation1] sm:$0x1]  }
   0xa   :  { %11 = vrot.lane.b32.xlu0 %v10_v1, %s36_s0  ;;  %23 = vrot.lane.b32.xlu1 %v22_v2, %s37_s8  ;;  %v16_v4 = vld [vmem:[#allocation1 + $0x2] sm:$0x1]   ;;  %8 = vst.msk [vmem:[#allocation0] sm:$0x1] %vm7_vm0, %v6_v3  }
   0xe   :  { %17 = vrot.lane.b32.xlu0 %v16_v4, %s38_s9 }
  0x7c   :  { %v12_v5 = vpop.permute.xlu0 %11   ;;  %v24_v6 = vpop.permute.xlu1 %23  }
  0x7d   :  { %14 = vst.msk [vmem:[#allocation0] sm:$0x1] %vm13_vm1, %v12_v5  }
  0x80   :  { %v18_v7 = vpop.permute.xlu0 %17  }
  0x81   :  { %20 = vst.msk [vmem:[#allocation0] sm:$0x1] %vm19_vm2, %v18_v7  }
  0x82   :  { %26 = vst.msk [vmem:[#allocation0] sm:$0x1] %vm25_vm3, %v24_v6  }
  0x89   :  { %v30_v8 = vld [vmem:[#allocation0] sm:$0x1] }
  0x8a   :  { %32 = vst [vmem:[%s56_s1] sm:$0x1] %v30_v8 }

// kernel: unet_block_forward.1
= control target key start
LH: loop header
LB: loop body
LE: loop exit
PB: predicated region body
PF: predicated region fallthrough
CT: control target
= control target key end

     0   :  { %s2994_s15 = smov 0   ;;  %s4203_s0 = inlined_call_operand.vmem [shape: bf16[2,4,9,9,4], index: 0, kind: input, shape index: {}]   ;;  %s4204_s1 = inlined_call_operand.vmem [shape: bf16[64,8], index: 1, kind: input, shape index: {}]   ;;  %s4205_s2 = inlined_call_operand.vmem [shape: bf16[72,16], index: 2, kind: input, shape index: {}]   ;;  %s4206_s3 = inlined_call_operand.vmem [shape: f32[1,16], index: 3, kind: input, shape index: {}]   ;;  %s4207_s4 = inlined_call_operand.vmem [shape: f32[2,8,8,16], index: 4, kind: output, shape index: {}]  }
   0x1 LB: > { %s2675_s16 = sadd.s32 4294967295, %s2950_s15   ;;  %p2679_p0 = scmp.ge.s32.totalorder %s2950_s15, 1  ;;  %s2950_s15 = sphi %s2994_s15, %s14_s15  }
   0x2   : > { %p162_p1 = scmp.lt.s32.totalorder %s2950_s15, 3 }
   0x4   : > { %p163_p2 = pnand %p2679_p0, %p162_p1 }
   0x6   : > { %166 = sbr.rel (%p163_p2) target bundleno = 1025 (0x401), region = 36 }
   0xd   : > { %p188_p3 = scmp.lt.s32.totalorder %s2675_s16, 1  ;;  %s2952_s21 = smov 8  }
   0xe   : > { %s2953_s22 = smov 4   ;;  %s2954_s23 = smov 12  }
   0xf   : > { %s4271_s16 = smov (!%p188_p3, %s2675_s16), 1  ;;  %s2955_s24 = smov 16  }
  0x10   : > { %s2844_s17 = smul.u32 288, %s4271_s16  ;;  %s2956_s25 = smov 20  }
  0x11   : > { %s2957_s26 = smov 24   ;;  %s2958_s27 = smov 28  }
  0x12   : > { %s3008_s20 = scalar_lea.vmem %s4203_s0, %s2844_s17  ;;  %s2959_s28 = smov 32  }
  0x13   : > { %v203_v0 = vld [vmem:[%s3008_s20 + $0x8] ss:$8 sps:$4 sm:$0xff]   ;;  %v204_v1 = vld [vmem:[%s3008_s20 + $0x14] sm:$0x1]  ;;  %v202_v2 = vld [vmem:[%s3008_s20 + $0xc] sm:$0x1] }
  0x14   : > { %v275_v3 = vunpack.c.h.bf16 %v203_v0  ;;  %v276_v4 = vunpack.c.l.bf16 %v204_v1  ;;  %v273_v5 = vunpack.c.l.bf16 %v203_v0  ;;  %v274_v6 = vunpack.c.l.bf16 %v202_v2  ;;  %v207_v7 = vld [vmem:[%s3008_s20 + $0x18] ss:$8 sps:$4 sm:$0xff]   ;;  %v208_v8 = vld [vmem:[%s3008_s20 + $0x24] sm:$0x1]  ;;  %v206_v9 = vld [vmem:[%s3008_s20 + $0x1c] sm:$0x1] }
  0x15   : > { %v279_v10 = vunpack.c.h.bf16 %v207_v7  ;;  %v280_v11 = vunpack.c.l.bf16 %v208_v8  ;;  %v277_v12 = vunpack.c.l.bf16 %v207_v7  ;;  %v278_v13 = vunpack.c.l.bf16 %v206_v9  ;;  %v199_v24 = vld [vmem:[%s3008_s20] ss:$80 sps:$4 sm:$0xff]   ;;  %v200_v25 = vld [vmem:[%s3008_s20 + $0x4] sm:$0x1]  ;;  %v220_v43 = vld [vmem:[%s3008_s20 + $0x54] sm:$0x1] }
  0x16   : > { %vm347_vm0 = vcmp.gt.f32.partialorder %v275_v3, 0.0  ;;  %vm348_vm1 = vcmp.gt.f32.partialorder %v276_v4, 0.0  ;;  %v419_v14 = vmul.f32 0.2, %v275_v3  ;;  %v420_v15 = vmul.f32 0.2, %v276_v4 }
  0x17   : > { %vm345_vm2 = vcmp.gt.f32.partialorder %v273_v5, 0.0  ;;  %vm346_vm3 = vcmp.gt.f32.partialorder %v274_v6, 0.0  ;;  %v417_v16 = vmul.f32 0.2, %v273_v5  ;;  %v418_v17 = vmul.f32 0.2, %v274_v6 }
  0x18   : > { %v491_v18 = vsel %vm347_vm0, %v275_v3, %v419_v14  ;;  %v492_v19 = vsel %vm348_vm1, %v276_v4, %v420_v15  ;;  %vm351_vm4 = vcmp.gt.f32.partialorder %v279_v10, 0.0  ;;  %vm352_vm5 = vcmp.gt.f32.partialorder %v280_v11, 0.0  ;;  %v217_v58 = vld [vmem:[%s3008_s20 + $0x48] ss:$24 sps:$4 sm:$0xff]   ;;  %v224_v59 = vld [vmem:[%s3008_s20 + $0x64] sm:$0x1] }
  0x19   : > { %v3016_v20 = vpack.c.bf16 %v492_v19, %v491_v18  ;;  %v489_v21 = vsel %vm345_vm2, %v273_v5, %v417_v16  ;;  %v490_v22 = vsel %vm346_vm3, %v274_v6, %v418_v17  ;;  %v423_v23 = vmul.f32 0.2, %v279_v10  ;;  %v218_v63 = vld [vmem:[%s3008_s20 + $0x4c] sm:$0x1]  ;;  %v222_v15 = vld [vmem:[%s3008_s20 + $0x5c] sm:$0x1] }
  0x1a   : > { %v3020_v26 = vpack.c.bf16 %v490_v22, %v489_v21  ;;  %v424_v27 = vmul.f32 0.2, %v280_v11  ;;  %vm349_vm6 = vcmp.gt.f32.partialorder %v277_v12, 0.0  ;;  %vm350_vm7 = vcmp.gt.f32.partialorder %v278_v13, 0.0  ;;  %s2960_s29 = smov 36   ;;  %s2961_s30 = smov 40  }
  0x1b   : > { %677 = vrot.lane.b32.xlu1 %v3016_v20, %s2952_s21  ;;  %v495_v28 = vsel %vm351_vm4, %v279_v10, %v423_v23  ;;  %v421_v29 = vmul.f32 0.2, %v277_v12  ;;  %v422_v30 = vmul.f32 0.2, %v278_v13  ;;  %v610_v31 = vshrl.u32 %v3016_v20, 16  ;;  %s2962_s5 = smov 44  }
  0x1c   : > { %675 = vrot.lane.b32.xlu0 %v3020_v26, %s2952_s21  ;;  %v496_v32 = vsel %vm352_vm5, %v280_v11, %v424_v27  ;;  %v612_v33 = vshll.u32 %v3016_v20, 16  ;;  %v271_v34 = vunpack.c.l.bf16 %v199_v24  ;;  %v272_v35 = vunpack.c.l.bf16 %v200_v25  ;;  %v221_v10 = vld [vmem:[%s3008_s20 + $0x58] ss:$16 sps:$4 sm:$0xff]   ;;  %s2963_s6 = smov 48   ;;  %s2964_s7 = smov 52  }
  0x1d   : > { %v3029_v36 = vpack.c.bf16 %v496_v32, %v495_v28  ;;  %v493_v37 = vsel %vm349_vm6, %v277_v12, %v421_v29  ;;  %v494_v38 = vsel %vm350_vm7, %v278_v13, %v422_v30  ;;  %v605_v49 = vshll.u32 %v3020_v26, 16  ;;  %s2965_s8 = smov 56   ;;  %s2966_s17 = smov 60  }
  0x1e   : > { %v3031_v39 = vpack.c.bf16 %v494_v38, %v493_v37  ;;  %v614_v40 = vrot.slane %v612_v33, 1  ;;  %vm343_vm8 = vcmp.gt.f32.partialorder %v271_v34, 0.0  ;;  %vm344_vm9 = vcmp.gt.f32.partialorder %v272_v35, 0.0  ;;  %v226_v37 = vld [vmem:[%s3008_s20 + $0x6c] sm:$0x1] }
  0x1f   : > { %4212 = vst [vmem:[#allocation3_spill] sm:$0xff] %v3029_v36  ;;  %681 = vrot.lane.b32.xlu1 %v3029_v36, %s2952_s21  ;;  %v415_v41 = vmul.f32 0.2, %v271_v34  ;;  %v416_v42 = vmul.f32 0.2, %v272_v35  ;;  %v291_v52 = vunpack.c.h.bf16 %v199_v24  ;;  %v292_v53 = vunpack.c.l.bf16 %v220_v43 }
  0x20   : > { %679 = vrot.lane.b32.xlu0 %v3031_v39, %s2952_s21  ;;  %v615_v44 = vor.u32 %v614_v40, %v610_v31  ;;  %v617_v45 = vshrl.u32 %v3031_v39, 16  ;;  %v619_v46 = vshll.u32 %v3031_v39, 16  ;;  %v626_v54 = vshll.u32 %v3029_v36, 16 }
  0x21   : > { %v487_v47 = vsel %vm343_vm8, %v271_v34, %v415_v41  ;;  %v488_v48 = vsel %vm344_vm9, %v272_v35, %v416_v42  ;;  %v603_v60 = vshrl.u32 %v3020_v26, 16  ;;  %v607_v61 = vrot.slane %v605_v49, 1 }
  0x22   : > { %v3041_v50 = vpack.c.bf16 %v488_v48, %v487_v47  ;;  %v621_v51 = vrot.slane %v619_v46, 1  ;;  %v624_v62 = vshrl.u32 %v3029_v36, 16  ;;  %v435_v1 = vmul.f32 0.2, %v291_v52 }
  0x23   : > { %655 = vrot.lane.b32.xlu1 %v615_v44, %s2953_s22  ;;  %v436_v2 = vmul.f32 0.2, %v292_v53  ;;  %v295_v3 = vunpack.c.h.bf16 %v217_v58  ;;  %v628_v4 = vrot.slane %v626_v54, 1  ;;  %vm363_vm10 = vcmp.gt.f32.partialorder %v291_v52, 0.0 }
  0x24   : > { %v596_v55 = vshrl.u32 %v3041_v50, 16  ;;  %v598_v56 = vshll.u32 %v3041_v50, 16  ;;  %v622_v57 = vor.u32 %v621_v51, %v617_v45  ;;  %vm364_vm11 = vcmp.gt.f32.partialorder %v292_v53, 0.0  ;;  %v3080_v51 = vld [vmem:[%s3008_s20 + $0x28] ss:$120 sps:$4 sm:$0xff]  }
  0x25   : > { %v296_v5 = vunpack.c.l.bf16 %v224_v59  ;;  %v289_v7 = vunpack.c.l.bf16 %v217_v58  ;;  %v290_v8 = vunpack.c.l.bf16 %v218_v63  ;;  %v608_v9 = vor.u32 %v607_v61, %v603_v60  ;;  %v238_v61 = vld [vmem:[%s3008_s20 + $0x9c] sm:$0x1] }
  0x26   : > { %v600_v0 = vrot.slane %v598_v56, 1  ;;  %v507_v11 = vsel %vm363_vm10, %v291_v52, %v435_v1  ;;  %v508_v12 = vsel %vm364_vm11, %v292_v53, %v436_v2  ;;  %v439_v13 = vmul.f32 0.2, %v295_v3  ;;  %v210_v52 = vld [vmem:[%s3008_s20 + $0x2c] sm:$0x1] }
  0x27   : > { %657 = vrot.lane.b32.xlu1 %v622_v57, %s2953_s22  ;;  %v440_v14 = vmul.f32 0.2, %v296_v5  ;;  %v3057_v16 = vor.u32 %v628_v4, %v624_v62  ;;  %vm367_vm12 = vcmp.gt.f32.partialorder %v295_v3, 0.0  ;;  %vm368_vm13 = vcmp.gt.f32.partialorder %v296_v5, 0.0 }
  0x28   : > { %v601_v6 = vor.u32 %v600_v0, %v596_v55  ;;  %vm361_vm14 = vcmp.gt.f32.partialorder %v289_v7, 0.0  ;;  %v433_v17 = vmul.f32 0.2, %v289_v7  ;;  %v434_v18 = vmul.f32 0.2, %v290_v8 }
  0x29   : > { %v3059_v19 = vpack.c.bf16 %v508_v12, %v507_v11  ;;  %vm362_vm15 = vcmp.gt.f32.partialorder %v290_v8, 0.0  ;;  %v293_v21 = vunpack.c.l.bf16 %v221_v10  ;;  %v294_v22 = vunpack.c.l.bf16 %v222_v15 }
  0x2a   : > { %651 = vrot.lane.b32.xlu0 %v601_v6, %s2953_s22  ;;  %v511_v23 = vsel %vm367_vm12, %v295_v3, %v439_v13  ;;  %v512_v24 = vsel %vm368_vm13, %v296_v5, %v440_v14  ;;  %v505_v27 = vsel %vm361_vm14, %v289_v7, %v433_v17  ;;  %v506_v28 = vsel %vm362_vm15, %v290_v8, %v434_v18  ;;  %v236_v13 = vld [vmem:[%s3008_s20 + $0x94] sm:$0x1]  ;;  %v214_v14 = vld [vmem:[%s3008_s20 + $0x3c] sm:$0x1] }
  0x2b   : > { %700 = vrot.lane.b32.xlu1 %v615_v44, %s2954_s23  ;;  %v748_v25 = vshll.u32 %v3059_v19, 16  ;;  %v3065_v29 = vpack.c.bf16 %v512_v24, %v511_v23  ;;  %v437_v30 = vmul.f32 0.2, %v293_v21  ;;  %v438_v31 = vmul.f32 0.2, %v294_v22 }
  0x2c   : > { %vm365_vm0 = vcmp.gt.f32.partialorder %v293_v21, 0.0  ;;  %vm366_vm1 = vcmp.gt.f32.partialorder %v294_v22, 0.0  ;;  %v568_v32 = vpack.c.bf16 %v506_v28, %v505_v27  ;;  %v746_v33 = vshrl.u32 %v3059_v19, 16  ;;  %v241_v23 = vld [vmem:[%s3008_s20 + $0x38] ss:$112 sps:$4 sm:$0xff]  }
  0x2d   : > { %v750_v34 = vrot.slane %v748_v25, 1  ;;  %v762_v35 = vshll.u32 %v3065_v29, 16  ;;  %v509_v38 = vsel %vm365_vm0, %v293_v21, %v437_v30  ;;  %v510_v40 = vsel %vm366_vm1, %v294_v22, %v438_v31  ;;  %v242_v24 = vld [vmem:[%s3008_s20 + $0xac] sm:$0x1] }
  0x2e   : > { %653 = vrot.lane.b32.xlu0 %v608_v9, %s2953_s22  ;;  %v741_v41 = vshll.u32 %v568_v32, 16  ;;  %v297_v42 = vunpack.c.h.bf16 %v221_v10  ;;  %v298_v43 = vunpack.c.l.bf16 %v226_v37  ;;  %v760_v45 = vshrl.u32 %v3065_v29, 16  ;;  %v3118_v37 = vld [vmem:[%s3008_s20 + $0x30] ss:$16 sps:$4 sm:$0xff]  }
  0x2f   : > { %704 = vrot.lane.b32.xlu1 %v3057_v16, %s2954_s23  ;;  %v3076_v44 = vor.u32 %v750_v34, %v746_v33  ;;  %v764_v46 = vrot.slane %v762_v35, 1  ;;  %v570_v47 = vpack.c.bf16 %v510_v40, %v509_v38  ;;  %v739_v48 = vshrl.u32 %v568_v32, 16  ;;  %v212_v38 = vld [vmem:[%s3008_s20 + $0x34] sm:$0x1] }
  0x30   : > { %v743_v49 = vrot.slane %v741_v41, 1  ;;  %v441_v54 = vmul.f32 0.2, %v297_v42  ;;  %v442_v55 = vmul.f32 0.2, %v298_v43  ;;  %vm369_vm2 = vcmp.gt.f32.partialorder %v297_v42, 0.0 }
  0x31   : > { %v755_v53 = vshll.u32 %v570_v47, 16  ;;  %v3086_v56 = vor.u32 %v764_v46, %v760_v45  ;;  %vm370_vm3 = vcmp.gt.f32.partialorder %v298_v43, 0.0  ;;  %v281_v58 = vunpack.c.l.bf16 %v3080_v51 }
  0x32   : > { %698 = vrot.lane.b32.xlu0 %v608_v9, %s2954_s23  ;;  %v282_v59 = vunpack.c.l.bf16 %v210_v52  ;;  %v744_v60 = vor.u32 %v743_v49, %v739_v48  ;;  %v753_v62 = vshrl.u32 %v570_v47, 16  ;;  %v513_v0 = vsel %vm369_vm2, %v297_v42, %v441_v54  ;;  %v240_v48 = vld [vmem:[%s3008_s20 + $0xa4] sm:$0x1] }
  0x33   : > { %724 = vrot.lane.b32.xlu1 %v3059_v19, %s2955_s24  ;;  %v757_v63 = vrot.slane %v755_v53, 1  ;;  %v514_v1 = vsel %vm370_vm3, %v298_v43, %v442_v55  ;;  %v310_v3 = vunpack.c.l.bf16 %v238_v61  ;;  %v425_v4 = vmul.f32 0.2, %v281_v58 }
  0x34   : > { %v426_v5 = vmul.f32 0.2, %v282_v59  ;;  %v3094_v6 = vpack.c.bf16 %v514_v1, %v513_v0  ;;  %vm353_vm4 = vcmp.gt.f32.partialorder %v281_v58, 0.0  ;;  %vm354_vm5 = vcmp.gt.f32.partialorder %v282_v59, 0.0 }
  0x35   : > { %v758_v7 = vor.u32 %v757_v63, %v753_v62  ;;  %v454_v10 = vmul.f32 0.2, %v310_v3  ;;  %v497_v11 = vsel %vm353_vm4, %v281_v58, %v425_v4  ;;  %vm382_vm7 = vcmp.gt.f32.partialorder %v310_v3, 0.0 }
  0x36   : > { %702 = vrot.lane.b32.xlu0 %v622_v57, %s2954_s23  ;;  %v237_v57 = vld [vmem:[%s3008_s20 + $0x90] ss:$8 sps:$4 sm:$0xff]   ;;  %v769_v8 = vshll.u32 %v3094_v6, 16  ;;  %v498_v12 = vsel %vm354_vm5, %v282_v59, %v426_v5  ;;  %v767_v17 = vshrl.u32 %v3094_v6, 16  ;;  %v308_v27 = vunpack.c.l.bf16 %v236_v13 }
  0x37   : > { %728 = vrot.lane.b32.xlu1 %v3065_v29, %s2955_s24  ;;  %v309_v2 = vunpack.c.h.bf16 %v237_v57  ;;  %v307_v15 = vunpack.c.l.bf16 %v237_v57  ;;  %v3105_v22 = vpack.c.bf16 %v498_v12, %v497_v11  ;;  %v526_v25 = vsel %vm382_vm7, %v310_v3, %v454_v10 }
  0x38   : > { %v771_v18 = vrot.slane %v769_v8, 1  ;;  %v285_v28 = vunpack.c.l.bf16 %v241_v23  ;;  %v286_v30 = vunpack.c.l.bf16 %v214_v14  ;;  %v313_v31 = vunpack.c.h.bf16 %v241_v23 }
  0x39   : > { %v453_v9 = vmul.f32 0.2, %v309_v2  ;;  %vm381_vm6 = vcmp.gt.f32.partialorder %v309_v2, 0.0  ;;  %4213 = vst [vmem:[#allocation4_spill] sm:$0xff] %v3105_v22  ;;  %v633_v35 = vshll.u32 %v3105_v22, 16  ;;  %vm379_vm8 = vcmp.gt.f32.partialorder %v307_v15, 0.0 }
  0x3a   : > { %722 = vrot.lane.b32.xlu0 %v568_v32, %s2955_s24  ;;  %v314_v32 = vunpack.c.l.bf16 %v242_v24  ;;  %v3112_v33 = vor.u32 %v771_v18, %v767_v17  ;;  %vm380_vm9 = vcmp.gt.f32.partialorder %v308_v27, 0.0  ;;  %v429_v40 = vmul.f32 0.2, %v285_v28 }
  0x3b   : > { %796 = vrot.lane.b32.xlu1 %v3076_v44, %s2956_s25  ;;  %v525_v21 = vsel %vm381_vm6, %v309_v2, %v453_v9  ;;  %v430_v41 = vmul.f32 0.2, %v286_v30  ;;  %v452_v42 = vmul.f32 0.2, %v308_v27  ;;  %vm357_vm10 = vcmp.gt.f32.partialorder %v285_v28, 0.0 }
  0x3c   : > { %v3114_v34 = vpack.c.bf16 %v526_v25, %v525_v21  ;;  %vm358_vm11 = vcmp.gt.f32.partialorder %v286_v30, 0.0  ;;  %vm385_vm12 = vcmp.gt.f32.partialorder %v313_v31, 0.0  ;;  %vm386_vm13 = vcmp.gt.f32.partialorder %v314_v32, 0.0 }
  0x3d   : > { %v457_v43 = vmul.f32 0.2, %v313_v31  ;;  %v458_v45 = vmul.f32 0.2, %v314_v32  ;;  %v631_v46 = vshrl.u32 %v3105_v22, 16  ;;  %v283_v49 = vunpack.c.l.bf16 %v3118_v37 }
  0x3e   : > { %726 = vrot.lane.b32.xlu0 %v570_v47, %s2955_s24  ;;  %v284_v52 = vunpack.c.l.bf16 %v212_v38  ;;  %v501_v53 = vsel %vm357_vm10, %v285_v28, %v429_v40  ;;  %v502_v54 = vsel %vm358_vm11, %v286_v30, %v430_v41  ;;  %v311_v57 = vunpack.c.h.bf16 %v3080_v51 }
  0x3f   : > { %800 = vrot.lane.b32.xlu1 %v3086_v56, %s2956_s25  ;;  %v529_v58 = vsel %vm385_vm12, %v313_v31, %v457_v43  ;;  %v530_v59 = vsel %vm386_vm13, %v314_v32, %v458_v45  ;;  %v884_v61 = vshll.u32 %v3114_v34, 16  ;;  %v3140_v63 = vpack.c.bf16 %v502_v54, %v501_v53  ;;  %v243_v45 = vld [vmem:[%s3008_s20 + $0xb0] ss:$48 sps:$4 sm:$0xff]  }
  0x40   : > { %v427_v0 = vmul.f32 0.2, %v283_v49  ;;  %v428_v51 = vmul.f32 0.2, %v284_v52  ;;  %vm355_vm14 = vcmp.gt.f32.partialorder %v283_v49, 0.0  ;;  %vm356_vm15 = vcmp.gt.f32.partialorder %v284_v52, 0.0 }
  0x41   : > { %4214 = vst [vmem:[#allocation5_spill] sm:$0xff] %v3140_v63  ;;  %vm383_vm0 = vcmp.gt.f32.partialorder %v311_v57, 0.0  ;;  %v3144_v1 = vpack.c.bf16 %v530_v59, %v529_v58  ;;  %v455_v2 = vmul.f32 0.2, %v311_v57  ;;  %v882_v4 = vshrl.u32 %v3114_v34, 16 }
  0x42   : > { %794 = vrot.lane.b32.xlu0 %v744_v60, %s2956_s25  ;;  %v312_v60 = vunpack.c.l.bf16 %v240_v48  ;;  %v886_v5 = vrot.slane %v884_v61, 1  ;;  %v499_v8 = vsel %vm355_vm14, %v283_v49, %v427_v0  ;;  %v500_v9 = vsel %vm356_vm15, %v284_v52, %v428_v51  ;;  %v228_v61 = vld [vmem:[%s3008_s20 + $0x74] sm:$0x1] }
  0x43   : > { %813 = vrot.lane.b32.xlu1 %v570_v47, %s2957_s26  ;;  %v635_v47 = vrot.slane %v633_v35, 1  ;;  %v527_v10 = vsel %vm383_vm0, %v311_v57, %v455_v2  ;;  %v645_v14 = vshrl.u32 %v3140_v63, 16  ;;  %v898_v25 = vshll.u32 %v3144_v1, 16 }
  0x44   : > { %v456_v3 = vmul.f32 0.2, %v312_v60  ;;  %vm384_vm1 = vcmp.gt.f32.partialorder %v312_v60, 0.0  ;;  %v3155_v13 = vor.u32 %v886_v5, %v882_v4  ;;  %v896_v31 = vshrl.u32 %v3144_v1, 16 }
  0x45   : > { %v3138_v62 = vor.u32 %v635_v47, %v631_v46  ;;  %v900_v32 = vrot.slane %v898_v25, 1  ;;  %v287_v35 = vunpack.c.h.bf16 %v3118_v37  ;;  %v244_v46 = vld [vmem:[%s3008_s20 + $0xb4] sm:$0x1]  ;;  %v315_v52 = vunpack.c.l.bf16 %v243_v45 }
  0x46   : > { %798 = vrot.lane.b32.xlu0 %v758_v7, %s2956_s25  ;;  %v528_v12 = vsel %vm384_vm1, %v312_v60, %v456_v3  ;;  %v316_v53 = vunpack.c.l.bf16 %v244_v46  ;;  %v227_v60 = vld [vmem:[%s3008_s20 + $0x70] ss:$104 sps:$4 sm:$0xff]   ;;  %v300_v2 = vunpack.c.l.bf16 %v228_v61 }
  0x47   : > { %817 = vrot.lane.b32.xlu1 %v3094_v6, %s2957_s26  ;;  %v579_v17 = vpack.c.bf16 %v528_v12, %v527_v10  ;;  %vm359_vm2 = vcmp.gt.f32.partialorder %v287_v35, 0.0  ;;  %vm387_vm4 = vcmp.gt.f32.partialorder %v315_v52, 0.0  ;;  %v327_v10 = vunpack.c.h.bf16 %v243_v45 }
  0x48   : > { %v460_v57 = vmul.f32 0.2, %v316_v53  ;;  %vm388_vm5 = vcmp.gt.f32.partialorder %v316_v53, 0.0  ;;  %vm372_vm7 = vcmp.gt.f32.partialorder %v300_v2, 0.0 }
  0x49   : > { %v891_v41 = vshll.u32 %v579_v17, 16  ;;  %v889_v47 = vshrl.u32 %v579_v17, 16 }
  0x4a   : > { %811 = vrot.lane.b32.xlu0 %v3059_v19, %s2957_s26  ;;  %v451_v19 = vmul.f32 0.2, %v307_v15  ;;  %v532_v59 = vsel %vm388_vm5, %v316_v53, %v460_v57 }
  0x4b   : > { %836 = vrot.lane.b32.xlu1 %v758_v7, %s2958_s27  ;;  %v647_v7 = vshll.u32 %v3140_v63, 16  ;;  %v893_v37 = vrot.slane %v891_v41, 1 }
  0x4c   : > { %v523_v55 = vsel %vm379_vm8, %v307_v15, %v451_v19  ;;  %v3176_v19 = vor.u32 %v900_v32, %v896_v31  ;;  %vm399_vm8 = vcmp.gt.f32.partialorder %v327_v10, 0.0 }
  0x4d   : > { %v649_v15 = vrot.slane %v647_v7, 1  ;;  %v894_v54 = vor.u32 %v893_v37, %v889_v47  ;;  %v444_v7 = vmul.f32 0.2, %v300_v2 }
  0x4e   : > { %815 = vrot.lane.b32.xlu0 %v3065_v29, %s2957_s26  ;;  %v524_v29 = vsel %vm380_vm9, %v308_v27, %v452_v42  ;;  %v216_v27 = vld [vmem:[%s3008_s20 + $0x44] sm:$0x1]  ;;  %v431_v42 = vmul.f32 0.2, %v287_v35 }
  0x4f   : > { %840 = vrot.lane.b32.xlu1 %v3112_v33, %s2958_s27  ;;  %v3163_v24 = vor.u32 %v649_v15, %v645_v14  ;;  %v288_v38 = vunpack.c.l.bf16 %v216_v27  ;;  %v516_v12 = vsel %vm372_vm7, %v300_v2, %v444_v7  ;;  %v231_v15 = vld [vmem:[%s3008_s20 + $0x78] ss:$8 sps:$4 sm:$0xff]   ;;  %v471_v27 = vmul.f32 0.2, %v327_v10 }
  0x50   : > { %v503_v48 = vsel %vm359_vm2, %v287_v35, %v431_v42  ;;  %v230_v35 = vld [vmem:[%s3008_s20 + $0x7c] sm:$0x1]  ;;  %v301_v47 = vunpack.c.l.bf16 %v231_v15 }
  0x51   : > { %v432_v43 = vmul.f32 0.2, %v288_v38  ;;  %vm360_vm3 = vcmp.gt.f32.partialorder %v288_v38, 0.0  ;;  %v543_v32 = vsel %vm399_vm8, %v327_v10, %v471_v27 }
  0x52   : > { %834 = vrot.lane.b32.xlu0 %v3076_v44, %s2958_s27  ;;  %v577_v44 = vpack.c.bf16 %v524_v29, %v523_v55  ;;  %v459_v29 = vmul.f32 0.2, %v315_v52  ;;  %vm373_vm14 = vcmp.gt.f32.partialorder %v301_v47, 0.0 }
  0x53   : > { %860 = vrot.lane.b32.xlu1 %v3114_v34, %s2959_s28  ;;  %v504_v49 = vsel %vm360_vm3, %v288_v38, %v432_v43  ;;  %v259_v38 = vld [vmem:[%s3008_s20 + $0xe8] ss:$8 sps:$4 sm:$0xff]  }
  0x54   : > { %v877_v11 = vshll.u32 %v577_v44, 16  ;;  %v875_v18 = vshrl.u32 %v577_v44, 16  ;;  %v567_v55 = vpack.c.bf16 %v504_v49, %v503_v48  ;;  %v531_v58 = vsel %vm387_vm4, %v315_v52, %v459_v29 }
  0x55   : > { %v3193_v0 = vpack.c.bf16 %v532_v59, %v531_v58  ;;  %v331_v49 = vunpack.c.h.bf16 %v259_v38  ;;  %v445_v58 = vmul.f32 0.2, %v301_v47 }
  0x56   : > { %838 = vrot.lane.b32.xlu0 %v3086_v56, %s2958_s27  ;;  %v3151_v56 = vpack.c.bf16 %v500_v9, %v499_v8  ;;  %v879_v21 = vrot.slane %v877_v11, 1  ;;  %v694_v51 = vshll.u32 %v567_v55, 16  ;;  %v692_v3 = vshrl.u32 %v567_v55, 16 }
  0x57   : > { %661 = vrot.lane.b32.xlu1 %v3138_v62, %s2953_s22  ;;  %v905_v9 = vshll.u32 %v3193_v0, 16  ;;  %vm403_vm0 = vcmp.gt.f32.partialorder %v331_v49, 0.0 }
  0x58   : > { %4215 = vst [vmem:[#allocation6_spill] sm:$0xff] %v3151_v56  ;;  %v640_v23 = vshll.u32 %v3151_v56, 16  ;;  %v880_v28 = vor.u32 %v879_v21, %v875_v18  ;;  %v638_v30 = vshrl.u32 %v3151_v56, 16  ;;  %v696_v4 = vrot.slane %v694_v51, 1  ;;  %v254_v18 = vld [vmem:[%s3008_s20 + $0xdc] sm:$0x1] }
  0x59   : > { %v325_v21 = vunpack.c.h.bf16 %v227_v60  ;;  %v907_v25 = vrot.slane %v905_v9, 1  ;;  %v326_v31 = vunpack.c.l.bf16 %v254_v18 }
  0x5a   : > { %858 = vrot.lane.b32.xlu0 %v577_v44, %s2959_s28  ;;  %v299_v44 = vunpack.c.l.bf16 %v227_v60  ;;  %v697_v8 = vor.u32 %v696_v4, %v692_v3 }
  0x5b   : > { %864 = vrot.lane.b32.xlu1 %v3144_v1, %s2959_s28  ;;  %v469_v42 = vmul.f32 0.2, %v325_v21  ;;  %v470_v46 = vmul.f32 0.2, %v326_v31  ;;  %vm397_vm12 = vcmp.gt.f32.partialorder %v325_v21, 0.0  ;;  %vm398_vm13 = vcmp.gt.f32.partialorder %v326_v31, 0.0 }
  0x5c   : > { %v443_v5 = vmul.f32 0.2, %v299_v44  ;;  %vm371_vm6 = vcmp.gt.f32.partialorder %v299_v44, 0.0 }
  0x5d   : > { %v541_v29 = vsel %vm397_vm12, %v325_v21, %v469_v42  ;;  %v542_v57 = vsel %vm398_vm13, %v326_v31, %v470_v46 }
  0x5e   : > { %659 = vrot.lane.b32.xlu0 %v3057_v16, %s2953_s22  ;;  %v642_v16 = vrot.slane %v640_v23, 1  ;;  %v515_v11 = vsel %vm371_vm6, %v299_v44, %v443_v5  ;;  %v903_v23 = vshrl.u32 %v3193_v0, 16  ;;  %v475_v44 = vmul.f32 0.2, %v331_v49 }
  0x5f   : > { %932 = vrot.lane.b32.xlu1 %v3155_v13, %s2960_s29  ;;  %v586_v4 = vpack.c.bf16 %v542_v57, %v541_v29  ;;  %v517_v5 = vsel %vm373_vm14, %v301_v47, %v445_v58 }
  0x60   : > { %v643_v40 = vor.u32 %v642_v16, %v638_v30  ;;  %v303_v30 = vunpack.c.h.bf16 %v231_v15  ;;  %v547_v10 = vsel %vm403_vm0, %v331_v49, %v475_v44 }
  0x62   : > { %862 = vrot.lane.b32.xlu0 %v579_v17, %s2959_s28  ;;  %v447_v43 = vmul.f32 0.2, %v303_v30  ;;  %vm375_vm10 = vcmp.gt.f32.partialorder %v303_v30, 0.0 }
  0x63   : > { %665 = vrot.lane.b32.xlu1 %v3163_v24, %s2953_s22 }
  0x64   : > { %v519_v53 = vsel %vm375_vm10, %v303_v30, %v447_v43  ;;  %v1011_v43 = vshrl.u32 %v586_v4, 16 }
  0x66   : > { %930 = vrot.lane.b32.xlu0 %v880_v28, %s2960_s29 }
  0x67   : > { %685 = vrot.lane.b32.xlu1 %v3151_v56, %s2952_s21 }
  0x6a   : > { %663 = vrot.lane.b32.xlu0 %v643_v40, %s2953_s22 }
  0x6b   : > { %936 = vrot.lane.b32.xlu1 %v3176_v19, %s2960_s29 }
  0x6e   : > { %683 = vrot.lane.b32.xlu0 %v3105_v22, %s2952_s21 }
  0x6f   : > { %949 = vrot.lane.b32.xlu1 %v579_v17, %s2961_s30  ;;  %v232_v17 = vld [vmem:[%s3008_s20 + $0x84] sm:$0x1] }
  0x70   : > { %v304_v16 = vunpack.c.l.bf16 %v232_v17 }
  0x72   : > { %934 = vrot.lane.b32.xlu0 %v894_v54, %s2960_s29  ;;  %v448_v45 = vmul.f32 0.2, %v304_v16  ;;  %vm376_vm11 = vcmp.gt.f32.partialorder %v304_v16, 0.0 }
  0x73   : > { %689 = vrot.lane.b32.xlu1 %v567_v55, %s2952_s21 }
  0x76   : > { %947 = vrot.lane.b32.xlu0 %v3114_v34, %s2961_s30  ;;  %v256_v34 = vld [vmem:[%s3008_s20 + $0xe4] sm:$0x1] }
  0x77   : > { %708 = vrot.lane.b32.xlu1 %v643_v40, %s2954_s23  ;;  %v328_v14 = vunpack.c.l.bf16 %v256_v34  ;;  %v260_v40 = vld [vmem:[%s3008_s20 + $0xf4] sm:$0x1]  ;;  %v329_v34 = vunpack.c.l.bf16 %v259_v38 }
  0x78   : > { %v332_v52 = vunpack.c.l.bf16 %v260_v40 }
  0x79   : > { %v472_v28 = vmul.f32 0.2, %v328_v14  ;;  %vm400_vm9 = vcmp.gt.f32.partialorder %v328_v14, 0.0  ;;  %vm401_vm2 = vcmp.gt.f32.partialorder %v329_v34, 0.0  ;;  %v473_v18 = vmul.f32 0.2, %v329_v34 }
  0x7a   : > { %687 = vrot.lane.b32.xlu0 %v3140_v63, %s2952_s21  ;;  %v476_v2 = vmul.f32 0.2, %v332_v52  ;;  %vm404_vm1 = vcmp.gt.f32.partialorder %v332_v52, 0.0 }
  0x7b   : > { %953 = vrot.lane.b32.xlu1 %v3193_v0, %s2961_s30  ;;  %v544_v41 = vsel %vm400_vm9, %v328_v14, %v472_v28  ;;  %v545_v30 = vsel %vm401_vm2, %v329_v34, %v473_v18 }
  0x7c   : > { %v3226_v37 = vpack.c.bf16 %v544_v41, %v543_v32 }
  0x7e   : > { %706 = vrot.lane.b32.xlu0 %v3138_v62, %s2954_s23  ;;  %v3210_v62 = vpack.c.bf16 %v516_v12, %v515_v11  ;;  %v548_v11 = vsel %vm404_vm1, %v332_v52, %v476_v2  ;;  %v1020_v12 = vshll.u32 %v3226_v37, 16  ;;  %v233_v52 = vld [vmem:[%s3008_s20 + $0x88] ss:$112 sps:$4 sm:$0xff]  }
  0x7f   : > { %972 = vrot.lane.b32.xlu1 %v894_v54, %s2962_s5  ;;  %v520_v54 = vsel %vm376_vm11, %v304_v16, %v448_v45  ;;  %v3257_v17 = vpack.c.bf16 %v548_v11, %v547_v10  ;;  %v1013_v16 = vshll.u32 %v586_v4, 16  ;;  %v262_v10 = vld [vmem:[%s3008_s20 + $0xfc] sm:$0x1] }
  0x80   : > { %v776_v48 = vshll.u32 %v3210_v62, 16  ;;  %v774_v60 = vshrl.u32 %v3210_v62, 16  ;;  %v3237_v61 = vpack.c.bf16 %v520_v54, %v519_v53  ;;  %v234_v53 = vld [vmem:[%s3008_s20 + $0x8c] sm:$0x1] }
  0x81   : > { %v1015_v45 = vrot.slane %v1013_v16, 1  ;;  %v1032_v57 = vshrl.u32 %v3257_v17, 16 }
  0x82   : > { %951 = vrot.lane.b32.xlu0 %v3144_v1, %s2961_s30  ;;  %v3217_v1 = vor.u32 %v907_v25, %v903_v23  ;;  %v778_v51 = vrot.slane %v776_v48, 1  ;;  %v1018_v23 = vshrl.u32 %v3226_v37, 16  ;;  %v1022_v25 = vrot.slane %v1020_v12, 1 }
  0x83   : > { %712 = vrot.lane.b32.xlu1 %v697_v8, %s2954_s23  ;;  %v790_v27 = vshll.u32 %v3237_v61, 16 }
  0x84   : > { %v3249_v9 = vor.u32 %v778_v51, %v774_v60  ;;  %v3268_v32 = vor.u32 %v1022_v25, %v1018_v23  ;;  %v306_v60 = vunpack.c.l.bf16 %v234_v53  ;;  %v333_v23 = vunpack.c.h.bf16 %v233_v52  ;;  %v2870_v53 = vld [vmem:[%s4204_s1] sm:$0xff]  }
  0x85   : > { %v792_v38 = vrot.slane %v790_v27, 1  ;;  %v334_v25 = vunpack.c.l.bf16 %v262_v10  ;;  %2809 = vmatprep.subr.bf16.mxu0 %v2870_v53 }
  0x86   : > { %970 = vrot.lane.b32.xlu0 %v3155_v13, %s2962_s5  ;;  %v302_v13 = vunpack.c.l.bf16 %v230_v35  ;;  %v788_v35 = vshrl.u32 %v3237_v61, 16  ;;  %v450_v34 = vmul.f32 0.2, %v306_v60  ;;  %vm378_vm5 = vcmp.gt.f32.partialorder %v306_v60, 0.0  ;;  %2810 = vmatpush3.bf16.msra.mxu0 %v2870_v53 }
  0x87   : > { %732 = vrot.lane.b32.xlu1 %v3210_v62, %s2955_s24  ;;  %vm405_vm6 = vcmp.gt.f32.partialorder %v333_v23, 0.0  ;;  %vm406_vm7 = vcmp.gt.f32.partialorder %v334_v25, 0.0 }
  0x88   : > { %vm374_vm15 = vcmp.gt.f32.partialorder %v302_v13, 0.0  ;;  %v446_v59 = vmul.f32 0.2, %v302_v13  ;;  %v3279_v47 = vor.u32 %v792_v38, %v788_v35  ;;  %v477_v35 = vmul.f32 0.2, %v333_v23 }
  0x89   : > { %v478_v38 = vmul.f32 0.2, %v334_v25 }
  0x8a   : > { %710 = vrot.lane.b32.xlu0 %v3163_v24, %s2954_s23  ;;  %v258_v24 = vld [vmem:[%s3008_s20 + $0xec] sm:$0x1]  ;;  %v518_v7 = vsel %vm374_vm15, %v302_v13, %v446_v59  ;;  %v1034_v13 = vshll.u32 %v3257_v17, 16  ;;  %v305_v59 = vunpack.c.l.bf16 %v233_v52  ;;  %v246_v52 = vld [vmem:[%s3008_s20 + $0xbc] sm:$0x1] }
  0x8b   : > { %976 = vrot.lane.b32.xlu1 %v3217_v1, %s2962_s5  ;;  %v330_v8 = vunpack.c.l.bf16 %v258_v24  ;;  %v574_v15 = vpack.c.bf16 %v518_v7, %v517_v5 }
  0x8c   : > { %v1036_v24 = vrot.slane %v1034_v13, 1  ;;  %v449_v7 = vmul.f32 0.2, %v305_v59  ;;  %vm377_vm4 = vcmp.gt.f32.partialorder %v305_v59, 0.0 }
  0x8d   : > { %v3229_v55 = vpop.permute.xlu1 %677  ;;  %v474_v21 = vmul.f32 0.2, %v330_v8  ;;  %vm402_vm3 = vcmp.gt.f32.partialorder %v330_v8, 0.0  ;;  %v783_v46 = vshll.u32 %v574_v15, 16  ;;  %v781_v54 = vshrl.u32 %v574_v15, 16 }
  0x8e   : > { %730 = vrot.lane.b32.xlu0 %v3094_v6, %s2955_s24  ;;  %v3239_v3 = vpop.permute.xlu0 %675 }
  0x8f   : > { %996 = vrot.lane.b32.xlu1 %v3226_v37, %s2963_s6  ;;  %v546_v31 = vsel %vm402_vm3, %v330_v8, %v474_v21  ;;  %v785_v29 = vrot.slane %v783_v46, 1  ;;  %v522_v21 = vsel %vm378_vm5, %v306_v60, %v450_v34  ;;  %v550_v46 = vsel %vm406_vm7, %v334_v25, %v478_v38  ;;  %v2871_v60 = vld [vmem:[%s4204_s1 + $0x8] sm:$0xff]  }
  0x90   : > { %v588_v42 = vpack.c.bf16 %v546_v31, %v545_v30  ;;  %2811 = vmatprep.subr.bf16.mxu0 %v2871_v60 }
  0x91   : > { %v3241_v6 = vpop.permute.xlu1 %681  ;;  %v786_v44 = vor.u32 %v785_v29, %v781_v54  ;;  %2812 = vmatpush3.bf16.msra.mxu0 %v2871_v60 }
  0x92   : > { %974 = vrot.lane.b32.xlu0 %v3176_v19, %s2962_s5  ;;  %v3255_v19 = vpop.permute.xlu0 %679  ;;  %v1027_v2 = vshll.u32 %v588_v42, 16  ;;  %v1025_v11 = vshrl.u32 %v588_v42, 16 }
  0x93   : > { %736 = vrot.lane.b32.xlu1 %v3237_v61, %s2955_s24 }
  0x94   : > { %v1029_v12 = vrot.slane %v1027_v2, 1  ;;  %v250_v2 = vld [vmem:[%s3008_s20 + $0xcc] sm:$0x1] }
  0x95   : > { %v3252_v14 = vpop.permute.xlu1 %655 }
  0x96   : > { %994 = vrot.lane.b32.xlu0 %v586_v4, %s2963_s6  ;;  %v3298_v4 = vor.u32 %v1036_v24, %v1032_v57  ;;  %v1030_v30 = vor.u32 %v1029_v12, %v1025_v11  ;;  %v318_v24 = vunpack.c.l.bf16 %v246_v52 }
  0x97   : > { %804 = vrot.lane.b32.xlu1 %v3249_v9, %s2956_s25 }
  0x98   : > { %v462_v10 = vmul.f32 0.2, %v318_v24  ;;  %vm390_vm9 = vcmp.gt.f32.partialorder %v318_v24, 0.0 }
  0x99   : > { %v3263_v28 = vpop.permute.xlu1 %657 }
  0x9a   : > { %734 = vrot.lane.b32.xlu0 %v574_v15, %s2955_s24 }
  0x9b   : > { %1000 = vrot.lane.b32.xlu1 %v3257_v17, %s2963_s6 }
  0x9c   : > { %v3271_v40 = vpop.permute.xlu0 %651 }
  0x9d   : > { %v3273_v41 = vpop.permute.xlu1 %700 }
  0x9e   : > { %802 = vrot.lane.b32.xlu0 %v3112_v33, %s2956_s25  ;;  %v1016_v33 = vor.u32 %v1015_v45, %v1011_v43  ;;  %v549_v45 = vsel %vm405_vm6, %v333_v23, %v477_v35  ;;  %v534_v35 = vsel %vm390_vm9, %v318_v24, %v462_v10  ;;  %vm1156_vm9 = vcmask 97280  }
  0x9f   : > { %1068 = vrot.lane.b32.xlu1 %v3268_v32, %s2964_s7 }
  0xa0   : > { %v3282_v48 = vpop.permute.xlu0 %653 }
  0xa1   : > { %v3284_v49 = vpop.permute.xlu1 %704 }
  0xa2   : > { %998 = vrot.lane.b32.xlu0 %v588_v42, %s2963_s6 }
  0xa3   : > { %808 = vrot.lane.b32.xlu1 %v3279_v47, %s2956_s25 }
  0xa4   : > { %v3292_v58 = vpop.permute.xlu0 %698 }
  0xa5   : > { %v3294_v51 = vpop.permute.xlu1 %724 }
  0xa6   : > { %1066 = vrot.lane.b32.xlu0 %v1016_v33, %s2964_s7  ;;  %v3333_v33 = vpack.c.bf16 %v550_v46, %v549_v45  ;;  %v247_v45 = vld [vmem:[%s3008_s20 + $0xc0] ss:$16 sps:$4 sm:$0xff]   ;;  %v248_v46 = vld [vmem:[%s3008_s20 + $0xc4] sm:$0x1] }
  0xa7   : > { %821 = vrot.lane.b32.xlu1 %v574_v15, %s2957_s26  ;;  %v521_v15 = vsel %vm377_vm4, %v305_v59, %v449_v7  ;;  %v319_v60 = vunpack.c.l.bf16 %v247_v45 }
  0xa8   : > { %v3300_v5 = vpop.permute.xlu0 %702  ;;  %v576_v16 = vpack.c.bf16 %v522_v21, %v521_v15  ;;  %v322_v15 = vunpack.c.l.bf16 %v250_v2  ;;  %v1041_v23 = vshll.u32 %v3333_v33, 16  ;;  %v1039_v53 = vshrl.u32 %v3333_v33, 16 }
  0xa9   : > { %v3302_v8 = vpop.permute.xlu1 %728  ;;  %vm391_vm12 = vcmp.gt.f32.partialorder %v319_v60, 0.0 }
  0xaa   : > { %806 = vrot.lane.b32.xlu0 %v786_v44, %s2956_s25  ;;  %v830_v54 = vshll.u32 %v576_v16, 16  ;;  %vm394_vm11 = vcmp.gt.f32.partialorder %v322_v15, 0.0 }
  0xab   : > { %1072 = vrot.lane.b32.xlu1 %v3298_v4, %s2964_s7 }
  0xac   : > { %v3308_v18 = vpop.permute.xlu0 %722 }
  0xad   : > { %v3310_v27 = vpop.permute.xlu1 %796 }
  0xae   : > { %819 = vrot.lane.b32.xlu0 %v3210_v62, %s2957_s26 }
  0xaf   : > { %1085 = vrot.lane.b32.xlu1 %v588_v42, %s2965_s8  ;;  %v245_v42 = vld [vmem:[%s3008_s20 + $0xb8] ss:$16 sps:$4 sm:$0xff]  }
  0xb0   : > { %v3315_v31 = vpop.permute.xlu0 %726  ;;  %v317_v57 = vunpack.c.l.bf16 %v245_v42  ;;  %v321_v12 = vunpack.c.h.bf16 %v245_v42  ;;  %v466_v42 = vmul.f32 0.2, %v322_v15 }
  0xb1   : > { %v3317_v43 = vpop.permute.xlu1 %800 }
  0xb2   : > { %1070 = vrot.lane.b32.xlu0 %v1030_v30, %s2964_s7  ;;  %v461_v34 = vmul.f32 0.2, %v317_v57  ;;  %vm389_vm8 = vcmp.gt.f32.partialorder %v317_v57, 0.0  ;;  %vm393_vm10 = vcmp.gt.f32.partialorder %v321_v12, 0.0 }
  0xb3   : > { %825 = vrot.lane.b32.xlu1 %v576_v16, %s2957_s26 }
  0xb4   : > { %v3321_v62 = vpop.permute.xlu0 %794 }
  0xb5   : > { %v3323_v13 = vpop.permute.xlu1 %813 }
  0xb6   : > { %1083 = vrot.lane.b32.xlu0 %v3226_v37, %s2965_s8  ;;  %v828_v37 = vshrl.u32 %v576_v16, 16  ;;  %v533_v16 = vsel %vm389_vm8, %v317_v57, %v461_v34  ;;  %vm1122_vm8 = vcmask 31744  }
  0xb7   : > { %844 = vrot.lane.b32.xlu1 %v786_v44, %s2958_s27  ;;  %v832_v44 = vrot.slane %v830_v54, 1  ;;  %v3370_v52 = vpack.c.bf16 %v534_v35, %v533_v16  ;;  %v1043_v54 = vrot.slane %v1041_v23, 1  ;;  %v463_v23 = vmul.f32 0.2, %v319_v60  ;;  %v252_v35 = vld [vmem:[%s3008_s20 + $0xd4] sm:$0x1] }
  0xb8   : > { %v3335_v29 = vpop.permute.xlu0 %798 }
  0xb9   : > { %v3337_v59 = vpop.permute.xlu1 %817  ;;  %v833_v21 = vor.u32 %v832_v44, %v828_v37  ;;  %v320_v37 = vunpack.c.l.bf16 %v248_v46  ;;  %v538_v44 = vsel %vm394_vm11, %v322_v15, %v466_v42  ;;  %v3381_v2 = vor.u32 %v1043_v54, %v1039_v53 }
  0xba   : > { %823 = vrot.lane.b32.xlu0 %v3237_v61, %s2957_s26  ;;  %v2872_v61 = vld [vmem:[%s4204_s1 + $0x10] sm:$0xff]   ;;  %v912_v34 = vshll.u32 %v3370_v52, 16  ;;  %v324_v53 = vunpack.c.l.bf16 %v252_v35  ;;  %vm1173_vm11 = vcmask 130048  }
  0xbb   : > { %1089 = vrot.lane.b32.xlu1 %v3333_v33, %s2965_s8  ;;  %2813 = vmatprep.subr.bf16.mxu0 %v2872_v61  ;;  %v464_v16 = vmul.f32 0.2, %v320_v37  ;;  %vm392_vm13 = vcmp.gt.f32.partialorder %v320_v37, 0.0  ;;  %v263_v35 = vld [vmem:[%s3008_s20 + $0x100] ss:$16 sps:$4 sm:$0xff]  }
  0xbc   : > { %v3347_v7 = vpop.permute.xlu0 %811  ;;  %2814 = vmatpush3.bf16.msra.mxu0 %v2872_v61  ;;  %vm396_vm15 = vcmp.gt.f32.partialorder %v324_v53, 0.0  ;;  %v335_v36 = vunpack.c.l.bf16 %v263_v35 }
  0xbd   : > { %v3349_v11 = vpop.permute.xlu1 %836  ;;  %v536_v42 = vsel %vm392_vm13, %v320_v37, %v464_v16  ;;  %vm1207_vm13 = vcmask 195584  }
  0xbe   : > { %842 = vrot.lane.b32.xlu0 %v3249_v9, %s2958_s27  ;;  %v2873_v9 = vld [vmem:[%s4204_s1 + $0x18] sm:$0xff]   ;;  %vm407_vm0 = vcmp.gt.f32.partialorder %v335_v36, 0.0 }
  0xbf   : > { %1108 = vrot.lane.b32.xlu1 %v1030_v30, %s2966_s17  ;;  %v465_v30 = vmul.f32 0.2, %v321_v12  ;;  %2815 = vmatprep.subr.bf16.mxu0 %v2873_v9 }
  0xc0   : > { %v3358_v25 = vpop.permute.xlu0 %815  ;;  %2816 = vmatpush3.bf16.msra.mxu0 %v2873_v9 }
  0xc1   : > { %v3360_v38 = vpop.permute.xlu1 %840 }
  0xc2   : > { %1087 = vrot.lane.b32.xlu0 %v3257_v17, %s2965_s8  ;;  %v537_v17 = vsel %vm393_vm10, %v321_v12, %v465_v30  ;;  %v914_v12 = vrot.slane %v912_v34, 1  ;;  %v535_v30 = vsel %vm391_vm12, %v319_v60, %v463_v23  ;;  %v468_v60 = vmul.f32 0.2, %v324_v53 }
  0xc3   : > { %848 = vrot.lane.b32.xlu1 %v833_v21, %s2958_s27  ;;  %v3388_v21 = vpack.c.bf16 %v538_v44, %v537_v17  ;;  %v583_v56 = vpack.c.bf16 %v536_v42, %v535_v30  ;;  %v264_v30 = vld [vmem:[%s3008_s20 + $0x104] sm:$0x1]  ;;  %vm1139_vm10 = vcmask 64512   ;;  %vm1190_vm12 = vcmask 162816  }
  0xc4   : > { %v3373_v57 = vpop.permute.xlu0 %834 }
  0xc5   : > { %v3375_v24 = vpop.permute.xlu1 %860  ;;  %v926_v15 = vshll.u32 %v3388_v21, 16  ;;  %v924_v17 = vshrl.u32 %v3388_v21, 16 }
  0xc6   : > { %1106 = vrot.lane.b32.xlu0 %v3268_v32, %s2966_s17  ;;  %v910_v32 = vshrl.u32 %v3370_v52, 16 }
  0xc7   : > { %868 = vrot.lane.b32.xlu1 %v3370_v52, %s2959_s28  ;;  %v928_v44 = vrot.slane %v926_v15, 1  ;;  %v540_v15 = vsel %vm396_vm15, %v324_v53, %v468_v60  ;;  %v268_v53 = vld [vmem:[%s3008_s20 + $0x114] sm:$0x1]  ;;  %v479_v60 = vmul.f32 0.2, %v335_v36  ;;  %vm1241_vm15 = vcmask 261120  }
  0xc8   : > { %v3384_v10 = vpop.permute.xlu0 %838  ;;  %v3405_v54 = vor.u32 %v914_v12, %v910_v32  ;;  %v917_v32 = vshrl.u32 %v583_v56, 16 }
  0xc9   : > { %4216 = vst [vmem:[#allocation7_spill] sm:$0xff] %v3384_v10  ;;  %v3386_v61 = vpop.permute.xlu1 %661  ;;  %v3416_v37 = vor.u32 %v928_v44, %v924_v17 }
  0xca   : > { %4217 = vst [vmem:[#allocation8_spill] sm:$0xff] %v3386_v61  ;;  %846 = vrot.lane.b32.xlu0 %v3279_v47, %s2958_s27  ;;  %v323_v47 = vunpack.c.h.bf16 %v247_v45 }
  0xcb   : > { %1112 = vrot.lane.b32.xlu1 %v3381_v2, %s2966_s17 }
  0xcc   : > { %v3397_v46 = vpop.permute.xlu0 %858  ;;  %v467_v45 = vmul.f32 0.2, %v323_v47  ;;  %vm395_vm14 = vcmp.gt.f32.partialorder %v323_v47, 0.0 }
  0xcd   : > { %v3399_v9 = vpop.permute.xlu1 %864 }
  0xce   : > { %866 = vrot.lane.b32.xlu0 %v3193_v0, %s2959_s28  ;;  %v919_v0 = vshll.u32 %v583_v56, 16  ;;  %v539_v12 = vsel %vm395_vm14, %v323_v47, %v467_v45  ;;  %vm1224_vm14 = vcmask 228352  }
  0xcf   : > { %872 = vrot.lane.b32.xlu1 %v3388_v21, %s2959_s28  ;;  %v585_v44 = vpack.c.bf16 %v540_v15, %v539_v12  ;;  %v339_v12 = vunpack.c.h.bf16 %v263_v35  ;;  %v340_v15 = vunpack.c.l.bf16 %v268_v53  ;;  %v266_v35 = vld [vmem:[%s3008_s20 + $0x10c] sm:$0x1] }
  0xd0   : > { %v3408_v34 = vpop.permute.xlu0 %659  ;;  %v338_v10 = vunpack.c.l.bf16 %v266_v35 }
  0xd1   : > { %4218 = vst [vmem:[#allocation9_spill] sm:$0xff] %v3408_v34  ;;  %v3410_v63 = vpop.permute.xlu1 %932  ;;  %v336_v34 = vunpack.c.l.bf16 %v264_v30  ;;  %v966_v47 = vshll.u32 %v585_v44, 16  ;;  %v265_v30 = vld [vmem:[%s3008_s20 + $0x108] ss:$16 sps:$4 sm:$0xff]   ;;  %v483_v61 = vmul.f32 0.2, %v339_v12 }
  0xd2   : > { %1110 = vrot.lane.b32.xlu0 %v3298_v4, %s2966_s17  ;;  %v921_v4 = vrot.slane %v919_v0, 1  ;;  %vm411_vm2 = vcmp.gt.f32.partialorder %v339_v12, 0.0  ;;  %vm412_vm3 = vcmp.gt.f32.partialorder %v340_v15, 0.0  ;;  %vm410_vm5 = vcmp.gt.f32.partialorder %v338_v10, 0.0 }
  0xd3   : > { %940 = vrot.lane.b32.xlu1 %v3405_v54, %s2960_s29  ;;  %vm408_vm1 = vcmp.gt.f32.partialorder %v336_v34, 0.0 }
  0xd4   : > { %v3418_v23 = vpop.permute.xlu0 %862 }
  0xd5   : > { %4219 = vst [vmem:[#allocation10_spill] sm:$0xff] %v3418_v23  ;;  %v3420_v16 = vpop.permute.xlu1 %665  ;;  %v484_v23 = vmul.f32 0.2, %v340_v15 }
  0xd6   : > { %4220 = vst [vmem:[#allocation11_spill] sm:$0xff] %v3420_v16  ;;  %870 = vrot.lane.b32.xlu0 %v583_v56, %s2959_s28  ;;  %v922_v16 = vor.u32 %v921_v4, %v917_v32  ;;  %v968_v32 = vrot.slane %v966_v47, 1 }
  0xd7   : > { %944 = vrot.lane.b32.xlu1 %v3416_v37, %s2960_s29 }
  0xd8   : > { %v3427_v42 = vpop.permute.xlu0 %930 }
  0xd9   : > { %v3429_v17 = vpop.permute.xlu1 %685 }
  0xda   : > { %4221 = vst [vmem:[#allocation12_spill] sm:$0xff] %v3429_v17  ;;  %938 = vrot.lane.b32.xlu0 %v3217_v1, %s2960_s29  ;;  %v480_v17 = vmul.f32 0.2, %v336_v34  ;;  %v964_v1 = vshrl.u32 %v585_v44, 16 }
  0xdb   : > { %957 = vrot.lane.b32.xlu1 %v583_v56, %s2961_s30 }
  0xdc   : > { %v3435_v0 = vpop.permute.xlu0 %663  ;;  %v552_v22 = vsel %vm408_vm1, %v336_v34, %v480_v17  ;;  %v969_v53 = vor.u32 %v968_v32, %v964_v1  ;;  %vm1275_vm1 = vcmask 326656  }
  0xdd   : > { %4222 = vst [vmem:[#allocation13_spill] sm:$0xff] %v3435_v0  ;;  %v3437_v45 = vpop.permute.xlu1 %936  ;;  %v551_v0 = vsel %vm407_vm0, %v335_v36, %v479_v60  ;;  %v555_v36 = vsel %vm411_vm2, %v339_v12, %v483_v61  ;;  %vm1258_vm0 = vcmask 293888   ;;  %vm1292_vm2 = vcmask 359424  }
  0xde   : > { %4223 = vst [vmem:[#allocation14_spill] sm:$0xff] %v3437_v45  ;;  %942 = vrot.lane.b32.xlu0 %v922_v16, %s2960_s29  ;;  %v337_v45 = vunpack.c.l.bf16 %v265_v30 }
  0xdf   : > { %961 = vrot.lane.b32.xlu1 %v585_v44, %s2961_s30 }
  0xe0   : > { %v3441_v56 = vpop.permute.xlu0 %683  ;;  %v481_v1 = vmul.f32 0.2, %v337_v45  ;;  %vm409_vm4 = vcmp.gt.f32.partialorder %v337_v45, 0.0 }
  0xe1   : > { %4224 = vst [vmem:[#allocation15_spill] sm:$0xff] %v3441_v56  ;;  %v3443_v4 = vpop.permute.xlu1 %949  ;;  %v3454_v56 = vpack.c.bf16 %v552_v22, %v551_v0  ;;  %v482_v22 = vmul.f32 0.2, %v338_v10  ;;  %v270_v0 = vld [vmem:[%s3008_s20 + $0x11c] sm:$0x1]  ;;  %s2968_s20 = smov 64  }
  0xe2   : > { %955 = vrot.lane.b32.xlu0 %v3370_v52, %s2961_s30  ;;  %v556_v52 = vsel %vm412_vm3, %v340_v15, %v484_v23  ;;  %v553_v32 = vsel %vm409_vm4, %v337_v45, %v481_v1  ;;  %vm1309_vm3 = vcmask 392192   ;;  %vm1326_vm4 = vcmask 424960  }
  0xe3   : > { %980 = vrot.lane.b32.xlu1 %v922_v16, %s2962_s5  ;;  %v1048_v34 = vshll.u32 %v3454_v56, 16  ;;  %v593_v60 = vpack.c.bf16 %v556_v52, %v555_v36  ;;  %v1046_v61 = vshrl.u32 %v3454_v56, 16  ;;  %v554_v35 = vsel %vm410_vm5, %v338_v10, %v482_v22 }
  0xe4   : > { %v3450_v44 = vpop.permute.xlu0 %934  ;;  %vm1343_vm5 = vcmask 457728  }
  0xe5   : > { %4225 = vst [vmem:[#allocation16_spill] sm:$0xff] %v3450_v44  ;;  %v3452_v47 = vpop.permute.xlu1 %689  ;;  %v1062_v23 = vshll.u32 %v593_v60, 16  ;;  %v1060_v52 = vshrl.u32 %v593_v60, 16 }
  0xe6   : > { %4226 = vst [vmem:[#allocation17_spill] sm:$0xff] %v3452_v47  ;;  %959 = vrot.lane.b32.xlu0 %v3388_v21, %s2961_s30  ;;  %v1050_v21 = vrot.slane %v1048_v34, 1  ;;  %v592_v34 = vpack.c.bf16 %v554_v35, %v553_v32 }
  0xe7   : > { %984 = vrot.lane.b32.xlu1 %v969_v53, %s2962_s5  ;;  %v342_v53 = vunpack.c.l.bf16 %v270_v0  ;;  %v1064_v47 = vrot.slane %v1062_v23, 1 }
  0xe8   : > { %v3460_v16 = vpop.permute.xlu0 %947  ;;  %v1051_v36 = vor.u32 %v1050_v21, %v1046_v61  ;;  %v1055_v45 = vshll.u32 %v592_v34, 16  ;;  %v1053_v61 = vshrl.u32 %v592_v34, 16 }
  0xe9   : > { %v3462_v17 = vpop.permute.xlu1 %708  ;;  %v486_v1 = vmul.f32 0.2, %v342_v53  ;;  %vm414_vm7 = vcmp.gt.f32.partialorder %v342_v53, 0.0 }
  0xea   : > { %4227 = vst [vmem:[#allocation18_spill] sm:$0xff] %v3462_v17  ;;  %978 = vrot.lane.b32.xlu0 %v3405_v54, %s2962_s5  ;;  %v341_v54 = vunpack.c.h.bf16 %v265_v30  ;;  %v1057_v21 = vrot.slane %v1055_v45, 1 }
  0xeb   : > { %1004 = vrot.lane.b32.xlu1 %v3454_v56, %s2963_s6  ;;  %v558_v0 = vsel %vm414_vm7, %v342_v53, %v486_v1  ;;  %vm1429_vm7 = vcmask 523264  }
  0xec   : > { %v3470_v12 = vpop.permute.xlu0 %687  ;;  %v485_v10 = vmul.f32 0.2, %v341_v54  ;;  %vm413_vm6 = vcmp.gt.f32.partialorder %v341_v54, 0.0 }
  0xed   : > { %4228 = vst [vmem:[#allocation19_spill] sm:$0xff] %v3470_v12  ;;  %v3472_v15 = vpop.permute.xlu1 %953 }
  0xee   : > { %982 = vrot.lane.b32.xlu0 %v3416_v37, %s2962_s5  ;;  %v1065_v37 = vor.u32 %v1064_v47, %v1060_v52  ;;  %v557_v23 = vsel %vm413_vm6, %v341_v54, %v485_v10  ;;  %v1058_v47 = vor.u32 %v1057_v21, %v1053_v61  ;;  %vm1360_vm6 = vcmask 490496  }
  0xef   : > { %1008 = vrot.lane.b32.xlu1 %v593_v60, %s2963_s6  ;;  %v594_v35 = vpack.c.bf16 %v558_v0, %v557_v23 }
  0xf0   : > { %v3477_v17 = vpop.permute.xlu0 %706 }
  0xf1   : > { %v3479_v44 = vpop.permute.xlu1 %972  ;;  %v1102_v52 = vshll.u32 %v594_v35, 16  ;;  %v1100_v54 = vshrl.u32 %v594_v35, 16 }
  0xf2   : > { %1002 = vrot.lane.b32.xlu0 %v3333_v33, %s2963_s6 }
  0xf3   : > { %1076 = vrot.lane.b32.xlu1 %v1051_v36, %s2964_s7  ;;  %v1104_v53 = vrot.slane %v1102_v52, 1 }
  0xf4   : > { %v3484_v30 = vpop.permute.xlu0 %951 }
  0xf5   : > { %v3486_v22 = vpop.permute.xlu1 %712 }
  0xf6   : > { %4229 = vst [vmem:[#allocation20_spill] sm:$0xff] %v3486_v22  ;;  %1006 = vrot.lane.b32.xlu0 %v592_v34, %s2963_s6 }
  0xf7   : > { %1080 = vrot.lane.b32.xlu1 %v1065_v37, %s2964_s7 }
  0xf8   : > { %v3490_v33 = vpop.permute.xlu0 %970 }
  0xf9   : > { %v3492_v32 = vpop.permute.xlu1 %732 }
  0xfa   : > { %1074 = vrot.lane.b32.xlu0 %v3381_v2, %s2964_s7  ;;  %v1105_v2 = vor.u32 %v1104_v53, %v1100_v54 }
  0xfb   : > { %1093 = vrot.lane.b32.xlu1 %v592_v34, %s2965_s8 }
  0xfc   : > { %v3497_v12 = vpop.permute.xlu0 %710 }
  0xfd   : > { %4230 = vst [vmem:[#allocation21_spill] sm:$0xff] %v3497_v12  ;;  %v3499_v22 = vpop.permute.xlu1 %976 }
  0xfe   : > { %1078 = vrot.lane.b32.xlu0 %v1058_v47, %s2964_s7 }
  0xff   : > { %1097 = vrot.lane.b32.xlu1 %v594_v35, %s2965_s8 }
 0x100   : > { %v3503_v45 = vpop.permute.xlu0 %730 }
 0x101   : > { %v3505_v10 = vpop.permute.xlu1 %996 }
 0x102   : > { %1091 = vrot.lane.b32.xlu0 %v3454_v56, %s2965_s8 }
 0x103   : > { %1116 = vrot.lane.b32.xlu1 %v1058_v47, %s2966_s17 }
 0x104   : > { %v3510_v34 = vpop.permute.xlu0 %974 }
 0x105   : > { %v3512_v1 = vpop.permute.xlu1 %736 }
 0x106   : > { %4231 = vst [vmem:[#allocation22_spill] sm:$0xff] %v3512_v1  ;;  %1095 = vrot.lane.b32.xlu0 %v593_v60, %s2965_s8  ;;  %v1126_v1 = vsel %vm1122_vm8, %v3020_v26, %v3282_v48 }
 0x107   : > { %1120 = vrot.lane.b32.xlu1 %v1105_v2, %s2966_s17 }
 0x108   : > { %v3516_v61 = vpop.permute.xlu0 %994 }
 0x109   : > { %v3518_v21 = vpop.permute.xlu1 %804 }
 0x10a   : > { %1114 = vrot.lane.b32.xlu0 %v1051_v36, %s2966_s17 }
 0x10c   : > { %v3521_v23 = vpop.permute.xlu0 %734 }
 0x10d   : > { %4232 = vst [vmem:[#allocation23_spill] sm:$0xff] %v3521_v23  ;;  %v3523_v56 = vpop.permute.xlu1 %1000 }
 0x10e   : > { %1118 = vrot.lane.b32.xlu0 %v1065_v37, %s2966_s17 }
 0x110   : > { %v3526_v0 = vpop.permute.xlu0 %802 }
 0x111   : > { %4233 = vst [vmem:[#allocation24_spill] sm:$0xff] %v3526_v0  ;;  %v1069_v35 = vpop.permute.xlu1 %1068 }
 0x114   : > { %v3528_v47 = vpop.permute.xlu0 %998 }
 0x115   : > { %v3530_v60 = vpop.permute.xlu1 %808 }
 0x116   : > { %4234 = vst [vmem:[#allocation25_spill] sm:$0xff] %v3530_v60 }
 0x118   : > { %v1067_v52 = vpop.permute.xlu0 %1066 }
 0x119   : > { %v3532_v54 = vpop.permute.xlu1 %821 }
 0x11c   : > { %v3534_v53 = vpop.permute.xlu0 %806 }
 0x11d   : > { %4235 = vst [vmem:[#allocation26_spill] sm:$0xff] %v3534_v53  ;;  %v3536_v2 = vpop.permute.xlu1 %1072  ;;  %v1124_v53 = vsel %vm1122_vm8, %v3041_v50, %v3271_v40 }
 0x11e   : > { %v1141_v26 = vsel %vm1139_vm10, %v1124_v53, %v3239_v3 }
 0x11f   : > { %v1158_v40 = vsel %vm1156_vm9, %v1141_v26, %v3292_v58 }
 0x120   : > { %v3538_v36 = vpop.permute.xlu0 %819 }
 0x121   : > { %4236 = vst [vmem:[#allocation27_spill] sm:$0xff] %v3538_v36  ;;  %v1086_v23 = vpop.permute.xlu1 %1085  ;;  %v1143_v36 = vsel %vm1139_vm10, %v1126_v1, %v3229_v55 }
 0x124   : > { %v3540_v12 = vpop.permute.xlu0 %1070 }
 0x125   : > { %v3542_v37 = vpop.permute.xlu1 %825 }
 0x126   : > { %4237 = vst [vmem:[#allocation28_spill] sm:$0xff] %v3542_v37  ;;  %v1160_v37 = vsel %vm1156_vm9, %v1143_v36, %v3273_v41  ;;  %v1175_v41 = vsel %vm1173_vm11, %v1158_v40, %v3308_v18 }
 0x127   : > { %v1177_v48 = vsel %vm1173_vm11, %v1160_v37, %v3294_v51  ;;  %v1192_v51 = vsel %vm1190_vm12, %v1175_v41, %v3321_v62 }
 0x128   : > { %v1084_v60 = vpop.permute.xlu0 %1083  ;;  %v1194_v55 = vsel %vm1190_vm12, %v1177_v48, %v3310_v27  ;;  %v1209_v58 = vsel %vm1207_vm13, %v1192_v51, %v3347_v7  ;;  %v4239_v51 = vld [vmem:[#allocation14_spill] sm:$0xff] }
 0x129   : > { %v3550_v0 = vpop.permute.xlu1 %844  ;;  %v1211_v3 = vsel %vm1207_vm13, %v1194_v55, %v3323_v13  ;;  %v1226_v18 = vsel %vm1224_vm14, %v1209_v58, %v3373_v57  ;;  %v4240_v58 = vld [vmem:[#allocation10_spill] sm:$0xff] }
 0x12a   : > { %v1228_v53 = vsel %vm1224_vm14, %v1211_v3, %v3349_v11  ;;  %v1243_v11 = vsel %vm1241_vm15, %v1226_v18, %v3397_v46 }
 0x12b   : > { %v1245_v27 = vsel %vm1241_vm15, %v1228_v53, %v3375_v24  ;;  %v1130_v24 = vsel %vm1122_vm8, %v3031_v39, %v3263_v28  ;;  %v1260_v37 = vsel %vm1258_vm0, %v1243_v11, %v3427_v42 }
 0x12c   : > { %v3560_v50 = vpop.permute.xlu0 %823  ;;  %v1262_v13 = vsel %vm1258_vm0, %v1245_v27, %v3410_v63  ;;  %v1277_v63 = vsel %vm1275_vm1, %v1260_v37, %v3460_v16  ;;  %v4241_v27 = vld [vmem:[#allocation16_spill] sm:$0xff] }
 0x12d   : > { %v3566_v1 = vpop.permute.xlu1 %1089  ;;  %v1279_v7 = vsel %vm1275_vm1, %v1262_v13, %v3443_v4  ;;  %v1128_v4 = vsel %vm1122_vm8, %v3016_v20, %v3252_v14  ;;  %v1294_v39 = vsel %vm1292_vm2, %v1277_v63, %v3490_v33 }
 0x12e   : > { %v1296_v57 = vsel %vm1292_vm2, %v1279_v7, %v3479_v44  ;;  %v1147_v44 = vsel %vm1139_vm10, %v1130_v24, %v3241_v6  ;;  %v1311_v16 = vsel %vm1309_vm3, %v1294_v39, %v3516_v61  ;;  %v1145_v33 = vsel %vm1139_vm10, %v1128_v4, %v3255_v19 }
 0x12f   : > { %v1313_v46 = vsel %vm1309_vm3, %v1296_v57, %v3505_v10  ;;  %v1164_v48 = vsel %vm1156_vm9, %v1147_v44, %v3284_v49  ;;  %v1328_v20 = vsel %vm1326_vm4, %v1311_v16, %v1067_v52  ;;  %v1162_v61 = vsel %vm1156_vm9, %v1145_v33, %v3300_v5 }
 0x130   : > { %v3580_v36 = vpop.permute.xlu0 %842  ;;  %v1330_v28 = vsel %vm1326_vm4, %v1313_v46, %v1069_v35  ;;  %v1181_v35 = vsel %vm1173_vm11, %v1164_v48, %v3302_v8  ;;  %v1345_v6 = vsel %vm1343_vm5, %v1328_v20, %v1084_v60  ;;  %v1179_v19 = vsel %vm1173_vm11, %v1162_v61, %v3315_v31  ;;  %v4238_v31 = vld [vmem:[#allocation7_spill] sm:$0xff] }
 0x131   : > { %v1109_v62 = vpop.permute.xlu1 %1108  ;;  %v1347_v10 = vsel %vm1343_vm5, %v1330_v28, %v1086_v23  ;;  %v1198_v23 = vsel %vm1190_vm12, %v1181_v35, %v3317_v43  ;;  %v1196_v60 = vsel %vm1190_vm12, %v1179_v19, %v3335_v29  ;;  %v4243_v19 = vld [vmem:[#allocation4_spill] sm:$0xff] }
 0x132   : > { %v1364_v14 = vsel %vm1360_vm6, %v1347_v10, %v1109_v62  ;;  %v1215_v8 = vsel %vm1207_vm13, %v1198_v23, %v3337_v59  ;;  %v1213_v43 = vsel %vm1207_vm13, %v1196_v60, %v3358_v25  ;;  %v4244_v60 = vld [vmem:[#allocation12_spill] sm:$0xff] }
 0x133   : > { %v1232_v5 = vsel %vm1224_vm14, %v1215_v8, %v3360_v38  ;;  %v1230_v59 = vsel %vm1224_vm14, %v1213_v43, %v4238_v31  ;;  %v4245_v43 = vld [vmem:[#allocation9_spill] sm:$0xff] }
 0x134   : > { %v1088_v26 = vpop.permute.xlu0 %1087  ;;  %v1249_v41 = vsel %vm1241_vm15, %v1232_v5, %v3399_v9  ;;  %v1247_v38 = vsel %vm1241_vm15, %v1230_v59, %v4240_v58  ;;  %v4247_v59 = vld [vmem:[#allocation18_spill] sm:$0xff] }
 0x135   : > { %v3607_v42 = vpop.permute.xlu1 %848  ;;  %v1266_v53 = vsel %vm1258_vm0, %v1249_v41, %v4239_v51  ;;  %v1264_v9 = vsel %vm1258_vm0, %v1247_v38, %v4241_v27  ;;  %v4246_v41 = vld [vmem:[#allocation3_spill] sm:$0xff]  ;;  %v4250_v27 = vld [vmem:[#allocation5_spill] sm:$0xff] }
 0x136   : > { %v1283_v25 = vsel %vm1275_vm1, %v1266_v53, %v3472_v15  ;;  %v1281_v13 = vsel %vm1275_vm1, %v1264_v9, %v3484_v30  ;;  %v1132_v31 = vsel %vm1122_vm8, %v4246_v41, %v4245_v43  ;;  %v4248_v53 = vld [vmem:[#allocation15_spill] sm:$0xff]  ;;  %v4259_v43 = vld [vmem:[#allocation21_spill] sm:$0xff] }
 0x137   : > { %v1300_v18 = vsel %vm1292_vm2, %v1283_v25, %v3499_v22  ;;  %v1298_v7 = vsel %vm1292_vm2, %v1281_v13, %v3510_v34  ;;  %v4249_v25 = vld [vmem:[#allocation11_spill] sm:$0xff] }
 0x138   : > { %v1107_v40 = vpop.permute.xlu0 %1106  ;;  %v1317_v62 = vsel %vm1309_vm3, %v1300_v18, %v3523_v56  ;;  %v1315_v37 = vsel %vm1309_vm3, %v1298_v7, %v3528_v47  ;;  %v1138_v9 = vsel %vm1122_vm8, %v4250_v27, %v4249_v25  ;;  %v4251_v7 = vld [vmem:[#allocation17_spill] sm:$0xff] }
 0x139   : > { %v1362_v49 = vsel %vm1360_vm6, %v1345_v6, %v1107_v40  ;;  %v3628_v52 = vpop.permute.xlu1 %868  ;;  %v1334_v15 = vsel %vm1326_vm4, %v1317_v62, %v3536_v2  ;;  %v1332_v30 = vsel %vm1326_vm4, %v1315_v37, %v3540_v12 }
 0x13a   : > { %v2683_v55 = vcombine.low %v1362_v49, %v1364_v14  ;;  %v1351_v22 = vsel %vm1343_vm5, %v1334_v15, %v3566_v1  ;;  %v1349_v57 = vsel %vm1343_vm5, %v1332_v30, %v1088_v26  ;;  %v4242_v49 = vld [vmem:[#allocation8_spill] sm:$0xff]  ;;  %v1155_v15 = vsel %vm1139_vm10, %v1138_v9, %v4251_v7  ;;  %v4253_v30 = vld [vmem:[#allocation6_spill] sm:$0xff] }
 0x13b   : > { %v1134_v8 = vsel %vm1122_vm8, %v4243_v19, %v4242_v49 }
 0x13c   : > { %2817 = vmatprep.mubr.msk.bf16.mxu0 %vm1429_vm7, %v2683_v55  ;;  %v3643_v3 = vpop.permute.xlu0 %846  ;;  %v1151_v5 = vsel %vm1139_vm10, %v1134_v8, %v4244_v60 }
 0x13d   : > { %v1113_v29 = vpop.permute.xlu1 %1112  ;;  %v1168_v51 = vsel %vm1156_vm9, %v1151_v5, %v4247_v59 }
 0x13e   : > { %v1368_v56 = vsel %vm1360_vm6, %v1351_v22, %v1113_v29  ;;  %v1149_v29 = vsel %vm1139_vm10, %v1132_v31, %v4248_v53  ;;  %v1185_v58 = vsel %vm1173_vm11, %v1168_v51, %v3492_v32  ;;  %v4252_v22 = vld [vmem:[#allocation13_spill] sm:$0xff]  ;;  %v4261_v53 = vld [vmem:[#allocation23_spill] sm:$0xff] }
 0x13f   : > { %v1166_v18 = vsel %vm1156_vm9, %v1149_v29, %v3477_v17  ;;  %v1202_v13 = vsel %vm1190_vm12, %v1185_v58, %v3518_v21  ;;  %v4260_v31 = vld [vmem:[#allocation25_spill] sm:$0xff]  ;;  %v4262_v58 = vld [vmem:[#allocation28_spill] sm:$0xff] }
 0x140   : > { %v3661_v11 = vpop.permute.xlu0 %866  ;;  %v1183_v37 = vsel %vm1173_vm11, %v1166_v18, %v3503_v45  ;;  %v1219_v32 = vsel %vm1207_vm13, %v1202_v13, %v3532_v54  ;;  %v4257_v45 = vld [vmem:[#allocation22_spill] sm:$0xff]  ;;  %v4258_v54 = vld [vmem:[#allocation27_spill] sm:$0xff] }
 0x141   : > { %v3667_v24 = vpop.permute.xlu1 %872  ;;  %v4263_v18 = vld [vmem:[#allocation26_spill] sm:$0xff] }
 0x144   : > { %v1111_v63 = vpop.permute.xlu0 %1110 }
 0x145   : > { %v1366_v34 = vsel %vm1360_vm6, %v1349_v57, %v1111_v63  ;;  %v941_v46 = vpop.permute.xlu1 %940  ;;  %v4254_v57 = vld [vmem:[#allocation20_spill] sm:$0xff] }
 0x146   : > { %v2684_v2 = vcombine.low %v1366_v34, %v1368_v56  ;;  %v1136_v56 = vsel %vm1122_vm8, %v4253_v30, %v4252_v22  ;;  %v1172_v17 = vsel %vm1156_vm9, %v1155_v15, %v4254_v57  ;;  %v4255_v63 = vld [vmem:[#allocation24_spill] sm:$0xff]  ;;  %v1236_v34 = vsel %vm1224_vm14, %v1219_v32, %v3550_v0 }
 0x147   : > { %v1200_v21 = vsel %vm1190_vm12, %v1183_v37, %v4255_v63  ;;  %v1189_v19 = vsel %vm1173_vm11, %v1172_v17, %v4257_v45  ;;  %v1253_v60 = vsel %vm1241_vm15, %v1236_v34, %v3628_v52  ;;  %vm1515_vm8 = vcmask 60416   ;;  %v1558_v34 = vld [vmem:[#allocation2 + $0x1c] sm:$0x1]  ;;  %v1526_v45 = vld [vmem:[#allocation2 + $0x8] sm:$0x1] }
 0x148   : > { %2818 = vmatmul.mubr.msk.bf16.vlgmr.msra.gmra.mrb[0].mxu0 %vm1429_vm7, %v2684_v2  ;;  %v3679_v4 = vpop.permute.xlu0 %870  ;;  %v4256_v2 = vld [vmem:[#allocation19_spill] sm:$0xff]  ;;  %v1217_v8 = vsel %vm1207_vm13, %v1200_v21, %v4258_v54  ;;  %v1206_v59 = vsel %vm1190_vm12, %v1189_v19, %v4260_v31  ;;  %v1270_v51 = vsel %vm1258_vm0, %v1253_v60, %v941_v46  ;;  %v1552_v19 = vld [vmem:[#allocation2 + $0xc] sm:$0x1] }
 0x149   : > { %v945_v47 = vpop.permute.xlu1 %944  ;;  %v1153_v49 = vsel %vm1139_vm10, %v1136_v56, %v4256_v2  ;;  %v1234_v0 = vsel %vm1224_vm14, %v1217_v8, %v3580_v36  ;;  %v1223_v25 = vsel %vm1207_vm13, %v1206_v59, %v4262_v58  ;;  %v1529_v31 = vld [vmem:[#allocation2 + $0x10] sm:$0x1] }
 0x14a   : > { %v1170_v41 = vsel %vm1156_vm9, %v1153_v49, %v4259_v43  ;;  %v1251_v52 = vsel %vm1241_vm15, %v1234_v0, %v3661_v11  ;;  %v1240_v36 = vsel %vm1224_vm14, %v1223_v25, %v3607_v42  ;;  %vm1517_vm9 = vcmask 57344  }
 0x14b   : > { %v1187_v29 = vsel %vm1173_vm11, %v1170_v41, %v4261_v53  ;;  %v1257_v37 = vsel %vm1241_vm15, %v1240_v36, %v3667_v24  ;;  %v1561_v41 = vld [vmem:[#allocation2 + $0x24] sm:$0x1] }
 0x14c   : > { %v939_v39 = vpop.permute.xlu0 %938  ;;  %v1204_v13 = vsel %vm1190_vm12, %v1187_v29, %v4263_v18  ;;  %v1274_v42 = vsel %vm1258_vm0, %v1257_v37, %v945_v47  ;;  %vm1524_vm12 = vsmask.f32 256 }
 0x14d   : > { %v958_v28 = vpop.permute.xlu1 %957  ;;  %v1268_v46 = vsel %vm1258_vm0, %v1251_v52, %v939_v39  ;;  %v1221_v15 = vsel %vm1207_vm13, %v1204_v13, %v3560_v50 }
 0x14e   : > { %v1287_v27 = vsel %vm1275_vm1, %v1270_v51, %v958_v28  ;;  %v1238_v22 = vsel %vm1224_vm14, %v1221_v15, %v3643_v3  ;;  %vm1550_vm14 = vsmask.f32 7938  ;;  %v1555_v51 = vld [vmem:[#allocation2 + $0x14] sm:$0x1] }
 0x14f   : > { %v1255_v50 = vsel %vm1241_vm15, %v1238_v22, %v3679_v4 }
 0x150   : > { %v3681_v1 = vpop.permute.xlu0 %942 }
 0x151   : > { %v962_v44 = vpop.permute.xlu1 %961 }
 0x152   : > { %v1291_v30 = vsel %vm1275_vm1, %v1274_v42, %v962_v44 }
 0x154   : > { %v956_v12 = vpop.permute.xlu0 %955 }
 0x155   : > { %v981_v16 = vpop.permute.xlu1 %980  ;;  %v1285_v11 = vsel %vm1275_vm1, %v1268_v46, %v956_v12 }
 0x156   : > { %v1304_v7 = vsel %vm1292_vm2, %v1287_v27, %v981_v16 }
 0x158   : > { %v3683_v10 = vpop.permute.xlu0 %959 }
 0x159   : > { %v985_v26 = vpop.permute.xlu1 %984 }
 0x15a   : > { %v1308_v3 = vsel %vm1292_vm2, %v1291_v30, %v985_v26 }
 0x15c   : > { %v979_v48 = vpop.permute.xlu0 %978 }
 0x15d   : > { %v1005_v20 = vpop.permute.xlu1 %1004  ;;  %v1302_v39 = vsel %vm1292_vm2, %v1285_v11, %v979_v48 }
 0x15e   : > { %v1321_v28 = vsel %vm1309_vm3, %v1304_v7, %v1005_v20  ;;  %v1272_v20 = vsel %vm1258_vm0, %v1255_v50, %v3681_v1  ;;  %vm3796_vm0 = vmand %vm1517_vm9, %vm1524_vm12  ;;  %v1570_v50 = vld [vmem:[#allocation2 + $0x3c] sm:$0x1] }
 0x15f   : > { %v1527_v8 = vsel %vm3796_vm0, 0, %v1526_v45  ;;  %v1530_v0 = vsel %vm3796_vm0, 0, %v1529_v31 }
 0x160   : > { %v3685_v14 = vpop.permute.xlu0 %982  ;;  %1528 = vst [vmem:[#allocation2 + $0x8] sm:$0x1] %v1527_v8  ;;  %1531 = vst [vmem:[#allocation2 + $0x10] sm:$0x1] %v1530_v0 }
 0x161   : > { %v1009_v33 = vpop.permute.xlu1 %1008 }
 0x162   : > { %v1325_v4 = vsel %vm1309_vm3, %v1308_v3, %v1009_v33 }
 0x164   : > { %v1003_v35 = vpop.permute.xlu0 %1002 }
 0x165   : > { %v1077_v6 = vpop.permute.xlu1 %1076  ;;  %v1319_v24 = vsel %vm1309_vm3, %v1302_v39, %v1003_v35 }
 0x166   : > { %v1338_v16 = vsel %vm1326_vm4, %v1321_v28, %v1077_v6  ;;  %v1289_v6 = vsel %vm1275_vm1, %v1272_v20, %v3683_v10  ;;  %v1564_v20 = vld [vmem:[#allocation2 + $0x2c] sm:$0x1] }
 0x167   : > { %v1682_v8 = vld [vmem:[#allocation2 + $0x8] sm:$0xf] }
 0x168   : > { %v3687_v40 = vpop.permute.xlu0 %1006 }
 0x169   : > { %v3689_v61 = vpop.permute.xlu1 %1080 }
 0x16a   : > { %v1342_v1 = vsel %vm1326_vm4, %v1325_v4, %v3689_v61 }
 0x16c   : > { %v1075_v23 = vpop.permute.xlu0 %1074 }
 0x16d   : > { %v1094_v55 = vpop.permute.xlu1 %1093  ;;  %v1336_v47 = vsel %vm1326_vm4, %v1319_v24, %v1075_v23 }
 0x16e   : > { %v1355_v12 = vsel %vm1343_vm5, %v1338_v16, %v1094_v55  ;;  %v1306_v55 = vsel %vm1292_vm2, %v1289_v6, %v3685_v14  ;;  %vm3803_vm2 = vmand %vm1517_vm9, %vm1550_vm14  ;;  %v1544_v16 = vld [vmem:[#allocation2 + $0x38] sm:$0x1]  ;;  %v1573_v6 = vld [vmem:[#allocation2 + $0x44] sm:$0x1] }
 0x16f   : > { %v1323_v23 = vsel %vm1309_vm3, %v1306_v55, %v3687_v40  ;;  %v2967_v40 = vmov 0   ;;  %v1559_v54 = vsel %vm3803_vm2, 0, %v1558_v34  ;;  %v1553_v60 = vsel %vm3803_vm2, 0, %v1552_v19 }
 0x170   : > { %v1079_v38 = vpop.permute.xlu0 %1078  ;;  %1516 = vst.msk [vmem:[#allocation2] sm:$0xf] %vm1515_vm8, %v2967_v40  ;;  %1520 = vst.msk [vmem:[#allocation2 + $0x48] sm:$0xf] %vm1515_vm8, %v2967_v40  ;;  %v1562_v59 = vsel %vm3803_vm2, 0, %v1561_v41  ;;  %v1556_v29 = vsel %vm3803_vm2, 0, %v1555_v51 }
 0x171   : > { %v1098_v62 = vpop.permute.xlu1 %1097  ;;  %v1340_v33 = vsel %vm1326_vm4, %v1323_v23, %v1079_v38  ;;  %1518 = vst.msk [vmem:[#allocation2 + $0x4] sm:$0x1] %vm1517_vm9, %v2967_v40  ;;  %1521 = vst.msk [vmem:[#allocation2 + $0x4c] sm:$0x1] %vm1517_vm9, %v2967_v40  ;;  %v1545_v30 = vsel %vm3796_vm0, 0, %v1544_v16  ;;  %v1571_v24 = vsel %vm3803_vm2, 0, %v1570_v50 }
 0x172   : > { %v1359_v57 = vsel %vm1343_vm5, %v1342_v1, %v1098_v62  ;;  %v1532_v62 = vld [vmem:[#allocation2 + $0x18] sm:$0x1]  ;;  %1560 = vst [vmem:[#allocation2 + $0x1c] sm:$0x1] %v1559_v54  ;;  %1554 = vst [vmem:[#allocation2 + $0xc] sm:$0x1] %v1553_v60 }
 0x173   : > { %v1533_v2 = vsel %vm3796_vm0, 0, %v1532_v62  ;;  %1563 = vst [vmem:[#allocation2 + $0x24] sm:$0x1] %v1562_v59  ;;  %1557 = vst [vmem:[#allocation2 + $0x14] sm:$0x1] %v1556_v29 }
 0x174   : > { %v1092_v5 = vpop.permute.xlu0 %1091  ;;  %1534 = vst [vmem:[#allocation2 + $0x18] sm:$0x1] %v1533_v2  ;;  %vm3823_vm4 = vmand %vm1515_vm8, %vm1550_vm14  ;;  %vm2530_vm8 = vcmask 588800  }
 0x175   : > { %v1117_v9 = vpop.permute.xlu1 %1116  ;;  %v1353_v44 = vsel %vm1343_vm5, %v1336_v47, %v1092_v5  ;;  %v1535_v5 = vld [vmem:[#allocation2 + $0x20] sm:$0x1]  ;;  %1546 = vst [vmem:[#allocation2 + $0x38] sm:$0x1] %v1545_v30  ;;  %1572 = vst [vmem:[#allocation2 + $0x3c] sm:$0x1] %v1571_v24 }
 0x176   : > { %v1372_v48 = vsel %vm1360_vm6, %v1355_v12, %v1117_v9  ;;  %v1536_v43 = vsel %vm3796_vm0, 0, %v1535_v5  ;;  %v1538_v12 = vld [vmem:[#allocation2 + $0x28] sm:$0x1]  ;;  %v1565_v47 = vsel %vm3803_vm2, 0, %v1564_v20 }
 0x177   : > { %1537 = vst [vmem:[#allocation2 + $0x20] sm:$0x1] %v1536_v43  ;;  %v1730_v53 = vld [vmem:[#allocation2] sm:$0xf]  ;;  %v1786_v27 = vld [vmem:[#allocation2 + $0x48] sm:$0xf] }
 0x178   : > { %v1096_v32 = vpop.permute.xlu0 %1095  ;;  %v1738_v58 = vld [vmem:[#allocation2 + $0x4] sm:$0x1]  ;;  %v3827_v9 = vld [vmem:[#allocation2 + $0x4c] sm:$0x1]  ;;  %v2750_v46 = vcombine.low %v1786_v27, %v1786_v27  ;;  %v1746_v37 = vld [vmem:[#allocation2] sm:$0xe] }
 0x179   : > { %v1121_v35 = vpop.permute.xlu1 %1120  ;;  %v1357_v63 = vsel %vm1343_vm5, %v1340_v33, %v1096_v32  ;;  %v2703_v25 = vcombine.low %v1730_v53, %v1738_v58  ;;  %v2758_v13 = vcombine.low %v1786_v27, %v3827_v9  ;;  %v2711_v22 = vcombine.low %v1746_v37, %v1738_v58  ;;  %1566 = vst [vmem:[#allocation2 + $0x2c] sm:$0x1] %v1565_v47  ;;  %v1697_v2 = vld [vmem:[#allocation2 + $0x1c] sm:$0x1]  ;;  %v1685_v41 = vld [vmem:[#allocation2 + $0xc] sm:$0x1] }
 0x17a   : > { %v1376_v17 = vsel %vm1360_vm6, %v1359_v57, %v1121_v35  ;;  %2185 = vrot.lane.b32.xlu1 %v2750_v46, %s2963_s6  ;;  %v1539_v3 = vsel %vm3796_vm0, 0, %v1538_v12  ;;  %v1567_v35 = vld [vmem:[#allocation2 + $0x34] sm:$0x1]  ;;  %v1703_v27 = vld [vmem:[#allocation2 + $0x24] sm:$0x1] }
 0x17b   : > { %v1846_v18 = vshll.u32 %v2703_v25, 16  ;;  %v1844_v36 = vshrl.u32 %v2703_v25, 16  ;;  %v2263_v15 = vshll.u32 %v2758_v13, 16  ;;  %v2261_v28 = vshrl.u32 %v2758_v13, 16  ;;  %1540 = vst [vmem:[#allocation2 + $0x28] sm:$0x1] %v1539_v3 }
 0x17c   : > { %v1115_v56 = vpop.permute.xlu0 %1114  ;;  %v1939_v39 = vrot.slane %v2711_v22, 1  ;;  %v1568_v1 = vsel %vm3803_vm2, 0, %v1567_v35  ;;  %v1694_v34 = vld [vmem:[#allocation2 + $0x18] sm:$0xf]  ;;  %v1688_v37 = vld [vmem:[#allocation2 + $0x10] sm:$0xf] }
 0x17d   : > { %v1370_v26 = vsel %vm1360_vm6, %v1353_v44, %v1115_v56  ;;  %v1848_v7 = vrot.slane %v1846_v18, 1  ;;  %v2265_v32 = vrot.slane %v2263_v15, 1  ;;  %v1574_v44 = vsel %vm3803_vm2, 0, %v1573_v6  ;;  %v1541_v56 = vld [vmem:[#allocation2 + $0x30] sm:$0x1] }
 0x17e   : > { %v2685_v10 = vcombine.low %v1370_v26, %v1372_v48  ;;  %v1547_v48 = vld [vmem:[#allocation2 + $0x40] sm:$0x1]  ;;  %1575 = vst [vmem:[#allocation2 + $0x44] sm:$0x1] %v1574_v44  ;;  %v1542_v55 = vsel %vm3796_vm0, 0, %v1541_v56 }
 0x17f   : > { %v1849_v11 = vor.u32 %v1848_v7, %v1844_v36  ;;  %v2266_v42 = vor.u32 %v2265_v32, %v2261_v28  ;;  %v1548_v4 = vsel %vm3796_vm0, 0, %v1547_v48  ;;  %1543 = vst [vmem:[#allocation2 + $0x30] sm:$0x1] %v1542_v55  ;;  %1569 = vst [vmem:[#allocation2 + $0x34] sm:$0x1] %v1568_v1 }
 0x180   : > { %2821 = vmatprep.mubr.msk.bf16.mxu0 %vm1429_vm7, %v2685_v10  ;;  %v1119_v14 = vpop.permute.xlu0 %1118  ;;  %1549 = vst [vmem:[#allocation2 + $0x40] sm:$0x1] %v1548_v4  ;;  %v1700_v29 = vld [vmem:[#allocation2 + $0x20] sm:$0xf] }
 0x181   : > { %v1374_v21 = vsel %vm1360_vm6, %v1357_v63, %v1119_v14  ;;  %1899 = vrot.lane.b32.xlu0 %v1849_v11, %s2952_s21  ;;  %2281 = vrot.lane.b32.xlu1 %v2266_v42, %s2965_s8  ;;  %v1691_v11 = vld [vmem:[#allocation2 + $0x14] sm:$0x1]  ;;  %vm2543_vm6 = vcmask 1043456  }
 0x182   : > { %v2686_v61 = vcombine.low %v1374_v21, %v1376_v17 }
 0x184   : > { %2822 = vmatmul.mubr.msk.bf16.gmra.mrb[4].mxu0 %vm1429_vm7, %v2686_v61 }
 0x185   : > { %1947 = vrot.lane.b32.xlu0 %v1939_v39, %s2955_s24 }
 0x21b   : > { %v2819_v26 = vpop.f32.mrb[0].mxu0 }
 0x21c   : > { %v1509_v23 = vmax.f32 %v2819_v26, 0.0  ;;  %v1476_v57 = vpop.f32.mrb[1].mxu0 }
 0x21d   : > { %v1507_v10 = vmax.f32 %v1476_v57, 0.0  ;;  %v2820_v33 = vpop.f32.mrb[2].mxu0 }
 0x21e   : > { %v2786_v17 = vpack.c.bf16 %v1509_v23, %v1509_v23  ;;  %v1510_v63 = vmax.f32 %v2820_v33, 0.0  ;;  %v1479_v14 = vpop.f32.mrb[3].mxu0 }
 0x21f   : > { %v2784_v21 = vpack.c.bf16 %v1507_v10, %v1507_v10  ;;  %v1508_v61 = vmax.f32 %v1479_v14, 0.0 }
 0x220   : > { %v1617_v40 = vshrl.u32 %v2786_v17, 16  ;;  %v2787_v62 = vpack.c.bf16 %v1510_v63, %v1510_v63  ;;  %v1620_v54 = vshll.u32 %v2786_v17, 16 }
 0x221   : > { %v1601_v45 = vshrl.u32 %v2784_v21, 16  ;;  %v2785_v19 = vpack.c.bf16 %v1508_v61, %v1508_v61  ;;  %v1604_v43 = vshll.u32 %v2784_v21, 16 }
 0x222   : > { %v1619_v49 = vrot.slane %v1617_v40, 7  ;;  %v1625_v60 = vshrl.u32 %v2787_v62, 16  ;;  %v1628_v53 = vshll.u32 %v2787_v62, 16 }
 0x223   : > { %v1603_v5 = vrot.slane %v1601_v45, 7  ;;  %v1609_v31 = vshrl.u32 %v2785_v19, 16  ;;  %v1612_v13 = vshll.u32 %v2785_v19, 16 }
 0x224   : > { %v1622_v59 = vor.u32 %v1620_v54, %v1619_v49  ;;  %v1623_v0 = vrot.slane %v1619_v49, 4  ;;  %v1627_v51 = vrot.slane %v1625_v60, 7 }
 0x225   : > { %v1606_v58 = vor.u32 %v1604_v43, %v1603_v5  ;;  %v1607_v25 = vrot.slane %v1603_v5, 4  ;;  %v1611_v18 = vrot.slane %v1609_v31, 7 }
 0x226   : > { %v1695_v36 = vsel %vm3823_vm4, %v1622_v59, %v1694_v34  ;;  %v1698_v46 = vsel %vm3796_vm0, %v1623_v0, %v1697_v2  ;;  %v1630_v7 = vor.u32 %v1628_v53, %v1627_v51  ;;  %v1631_v15 = vrot.slane %v1627_v51, 4 }
 0x227   : > { %1696 = vst [vmem:[#allocation2 + $0x18] sm:$0xf] %v1695_v36  ;;  %1699 = vst [vmem:[#allocation2 + $0x1c] sm:$0x1] %v1698_v46  ;;  %v1683_v28 = vsel %vm3823_vm4, %v1606_v58, %v1682_v8  ;;  %v1686_v32 = vsel %vm3796_vm0, %v1607_v25, %v1685_v41  ;;  %v1614_v22 = vor.u32 %v1612_v13, %v1611_v18  ;;  %v1615_v42 = vrot.slane %v1611_v18, 4 }
 0x228   : > { %1684 = vst [vmem:[#allocation2 + $0x8] sm:$0xf] %v1683_v28  ;;  %1687 = vst [vmem:[#allocation2 + $0xc] sm:$0x1] %v1686_v32  ;;  %v1701_v39 = vsel %vm3823_vm4, %v1630_v7, %v1700_v29  ;;  %v1704_v16 = vsel %vm3796_vm0, %v1631_v15, %v1703_v27 }
 0x229   : > { %1702 = vst [vmem:[#allocation2 + $0x20] sm:$0xf] %v1701_v39  ;;  %1705 = vst [vmem:[#allocation2 + $0x24] sm:$0x1] %v1704_v16  ;;  %v1689_v50 = vsel %vm3823_vm4, %v1614_v22, %v1688_v37  ;;  %v1692_v30 = vsel %vm3796_vm0, %v1615_v42, %v1691_v11 }
 0x22a   : > { %1690 = vst [vmem:[#allocation2 + $0x10] sm:$0xf] %v1689_v50  ;;  %1693 = vst [vmem:[#allocation2 + $0x14] sm:$0x1] %v1692_v30 }
 0x22e   : > { %v1780_v24 = vld [vmem:[#allocation2 + $0x18] sm:$0xf]  ;;  %v1741_v20 = vld [vmem:[#allocation2 + $0x1c] sm:$0x1] }
 0x22f   : > { %v3866_v12 = vld [vmem:[#allocation2 + $0x18] sm:$0xf]  ;;  %v2744_v3 = vcombine.low %v1780_v24, %v1780_v24  ;;  %v3870_v4 = vld [vmem:[#allocation2 + $0x8] sm:$0xf]  ;;  %v1764_v44 = vld [vmem:[#allocation2 + $0x1c] sm:$0x1] }
 0x230   : > { %v2721_v47 = vcombine.low %v3866_v12, %v3866_v12  ;;  %v1749_v48 = vld [vmem:[#allocation2 + $0x18] sm:$0xe]  ;;  %v2719_v55 = vcombine.low %v3870_v4, %v3870_v4  ;;  %v3876_v26 = vld [vmem:[#allocation2 + $0x20] sm:$0xf]  ;;  %v1788_v23 = vld [vmem:[#allocation2 + $0x1c] sm:$0x1]  ;;  %v2729_v22 = vcombine.low %v3866_v12, %v1764_v44 }
 0x231   : > { %v2714_v6 = vcombine.low %v1749_v48, %v1741_v20  ;;  %v1772_v56 = vld [vmem:[#allocation2 + $0x18] sm:$0xe]  ;;  %2173 = vrot.lane.b32.xlu1 %v2744_v3, %s2963_s6  ;;  %v2722_v33 = vcombine.low %v3876_v26, %v3876_v26  ;;  %v3882_v17 = vld [vmem:[#allocation2 + $0x20] sm:$0xf]  ;;  %v1762_v14 = vld [vmem:[#allocation2 + $0xc] sm:$0x1]  ;;  %v2752_v13 = vcombine.low %v1780_v24, %v1788_v23 }
 0x232   : > { %1991 = vrot.lane.b32.xlu0 %v2721_v47, %s2957_s26  ;;  %v2737_v1 = vcombine.low %v1772_v56, %v1764_v44  ;;  %v1796_v57 = vld [vmem:[#allocation2 + $0x18] sm:$0xe]  ;;  %v1770_v21 = vld [vmem:[#allocation2 + $0x8] sm:$0xe]  ;;  %v1739_v61 = vld [vmem:[#allocation2 + $0xc] sm:$0x1]  ;;  %v2745_v62 = vcombine.low %v3882_v17, %v3882_v17  ;;  %v2727_v48 = vcombine.low %v3870_v4, %v1762_v14 }
 0x233   : > { %v1942_v35 = vrot.slane %v2714_v6, 1  ;;  %v2760_v63 = vcombine.low %v1796_v57, %v1788_v23  ;;  %v1747_v40 = vld [vmem:[#allocation2 + $0x8] sm:$0xe]  ;;  %v2735_v2 = vcombine.low %v1770_v21, %v1762_v14  ;;  %v3890_v19 = vld [vmem:[#allocation2 + $0x18] sm:$0xf]  ;;  %v2221_v39 = vshll.u32 %v2752_v13, 16 }
 0x234   : > { %v2125_v10 = vrot.slane %v2737_v1, 1  ;;  %v2712_v45 = vcombine.low %v1747_v40, %v1739_v61  ;;  %v3892_v49 = vld [vmem:[#allocation2 + $0x10] sm:$0xf]  ;;  %v1789_v5 = vld [vmem:[#allocation2 + $0x24] sm:$0x1]  ;;  %v2706_v59 = vcombine.low %v3890_v19, %v1741_v20  ;;  %v2044_v23 = vshll.u32 %v2729_v22, 16 }
 0x235   : > { %1953 = vrot.lane.b32.xlu1 %v1942_v35, %s2955_s24  ;;  %v2308_v34 = vrot.slane %v2760_v63, 1  ;;  %v2123_v54 = vrot.slane %v2735_v2, 1  ;;  %v3894_v60 = vld [vmem:[#allocation2 + $0x10] sm:$0xf]  ;;  %v1797_v43 = vld [vmem:[#allocation2 + $0x20] sm:$0xe]  ;;  %v2743_v0 = vcombine.low %v3892_v49, %v3892_v49 }
 0x236   : > { %1987 = vrot.lane.b32.xlu0 %v2719_v55, %s2957_s26  ;;  %v1940_v8 = vrot.slane %v2712_v45, 1  ;;  %v1765_v41 = vld [vmem:[#allocation2 + $0x24] sm:$0x1]  ;;  %v1773_v31 = vld [vmem:[#allocation2 + $0x20] sm:$0xe]  ;;  %v2720_v51 = vcombine.low %v3894_v60, %v3894_v60  ;;  %v2761_v53 = vcombine.low %v1797_v43, %v1789_v5  ;;  %v1867_v36 = vshll.u32 %v2706_v59, 16 }
 0x237   : > { %v2738_v29 = vcombine.low %v1773_v31, %v1765_v41  ;;  %v1742_v58 = vld [vmem:[#allocation2 + $0x24] sm:$0x1]  ;;  %v1750_v25 = vld [vmem:[#allocation2 + $0x20] sm:$0xe]  ;;  %v3903_v27 = vld [vmem:[#allocation2 + $0x14] sm:$0x1]  ;;  %v2730_v12 = vcombine.low %v3876_v26, %v1765_v41 }
 0x238   : > { %v1771_v18 = vld [vmem:[#allocation2 + $0x10] sm:$0xe]  ;;  %v2309_v46 = vrot.slane %v2761_v53, 1  ;;  %v2715_v15 = vcombine.low %v1750_v25, %v1742_v58  ;;  %v3908_v11 = vld [vmem:[#allocation2 + $0x8] sm:$0xf]  ;;  %v1869_v42 = vrot.slane %v1867_v36, 1 }
 0x239   : > { %1993 = vrot.lane.b32.xlu1 %v2722_v33, %s2957_s26  ;;  %v2126_v7 = vrot.slane %v2738_v29, 1  ;;  %v2736_v37 = vcombine.low %v1771_v18, %v3903_v27  ;;  %v3910_v28 = vld [vmem:[#allocation2 + $0x14] sm:$0x1]  ;;  %v1748_v32 = vld [vmem:[#allocation2 + $0x10] sm:$0xe]  ;;  %v2704_v16 = vcombine.low %v3908_v11, %v1739_v61  ;;  %v1865_v20 = vshrl.u32 %v2706_v59, 16 }
 0x23a   : > { %2135 = vrot.lane.b32.xlu0 %v2125_v10, %s2961_s30  ;;  %v1943_v50 = vrot.slane %v2715_v15, 1  ;;  %v2713_v24 = vcombine.low %v1748_v32, %v3910_v28  ;;  %v3917_v3 = vld [vmem:[#allocation2 + $0x14] sm:$0x1]  ;;  %v1795_v47 = vld [vmem:[#allocation2 + $0x10] sm:$0xe]  ;;  %v2223_v44 = vrot.slane %v2221_v39, 1  ;;  %v2753_v10 = vcombine.low %v3882_v17, %v1789_v5 }
 0x23b   : > { %v2124_v30 = vrot.slane %v2736_v37, 1  ;;  %v1870_v6 = vor.u32 %v1869_v42, %v1865_v20  ;;  %v3923_v56 = vld [vmem:[#allocation2 + $0x20] sm:$0xf]  ;;  %v2759_v55 = vcombine.low %v1795_v47, %v3917_v3  ;;  %v1853_v1 = vshll.u32 %v2704_v16, 16  ;;  %v3934_v53 = vld [vmem:[#allocation2 + $0x10] sm:$0xf] }
 0x23c   : > { %v1941_v35 = vrot.slane %v2713_v24, 1  ;;  %v2219_v57 = vshrl.u32 %v2752_v13, 16  ;;  %v2707_v4 = vcombine.low %v3923_v56, %v1742_v58  ;;  %v2051_v26 = vshll.u32 %v2730_v12, 16 }
 0x23d   : > { %2317 = vrot.lane.b32.xlu1 %v2308_v34, %s2968_s20  ;;  %v2307_v63 = vrot.slane %v2759_v55, 1  ;;  %v1855_v14 = vrot.slane %v1853_v1, 1  ;;  %v2046_v21 = vrot.slane %v2044_v23, 1  ;;  %v2030_v61 = vshll.u32 %v2727_v48, 16 }
 0x23e   : > { %2175 = vrot.lane.b32.xlu0 %v2745_v62, %s2963_s6  ;;  %v2224_v33 = vor.u32 %v2223_v44, %v2219_v57  ;;  %v1851_v40 = vshrl.u32 %v2704_v16, 16  ;;  %v2042_v62 = vshrl.u32 %v2729_v22, 16  ;;  %v2053_v34 = vrot.slane %v2051_v26, 1  ;;  %v1718_v16 = vld [vmem:[#allocation2 + $0x38] sm:$0xf] }
 0x23f   : > { %v2228_v2 = vshll.u32 %v2753_v10, 16  ;;  %v2032_v17 = vrot.slane %v2030_v61, 1  ;;  %v1874_v5 = vshll.u32 %v2707_v4, 16  ;;  %v2049_v31 = vshrl.u32 %v2730_v12, 16 }
 0x240   : > { %v3938_v37 = vcombine.low %v3894_v60, %v3903_v27  ;;  %v2226_v42 = vshrl.u32 %v2753_v10, 16  ;;  %v3942_v39 = vcombine.low %v3934_v53, %v3910_v28  ;;  %v1872_v20 = vshrl.u32 %v2707_v4, 16  ;;  %v1706_v60 = vld [vmem:[#allocation2 + $0x28] sm:$0xf] }
 0x241   : > { %1949 = vrot.lane.b32.xlu1 %v1940_v8, %s2955_s24  ;;  %v2047_v8 = vor.u32 %v2046_v21, %v2042_v62  ;;  %v2054_v18 = vor.u32 %v2053_v34, %v2049_v31  ;;  %v2230_v13 = vrot.slane %v2228_v2, 1  ;;  %v1876_v15 = vrot.slane %v1874_v5, 1  ;;  %v1712_v2 = vld [vmem:[#allocation2 + $0x30] sm:$0xf] }
 0x242   : > { %2131 = vrot.lane.b32.xlu0 %v2123_v54, %s2961_s30  ;;  %v1856_v54 = vor.u32 %v1855_v14, %v1851_v40  ;;  %v1727_v14 = vld [vmem:[#allocation2 + $0x44] sm:$0x1] }
 0x243   : > { %v2231_v12 = vor.u32 %v2230_v13, %v2226_v42  ;;  %v1877_v28 = vor.u32 %v1876_v15, %v1872_v20 }
 0x245   : > { %1989 = vrot.lane.b32.xlu1 %v2720_v51, %s2957_s26  ;;  %v2028_v51 = vshrl.u32 %v2727_v48, 16 }
 0x246   : > { %2171 = vrot.lane.b32.xlu0 %v2743_v0, %s2963_s6 }
 0x249   : > { %2137 = vrot.lane.b32.xlu1 %v2126_v7, %s2961_s30  ;;  %v2033_v7 = vor.u32 %v2032_v17, %v2028_v51  ;;  %v2751_v51 = vcombine.low %v3892_v49, %v3917_v3  ;;  %v2035_v49 = vshrl.u32 %v3938_v37, 16  ;;  %v1858_v3 = vshrl.u32 %v3942_v39, 16 }
 0x24a   : > { %2319 = vrot.lane.b32.xlu0 %v2309_v46, %s2968_s20 }
 0x24d   : > { %2133 = vrot.lane.b32.xlu1 %v2124_v30, %s2961_s30 }
 0x24e   : > { %1955 = vrot.lane.b32.xlu0 %v1943_v50, %s2955_s24  ;;  %v1721_v50 = vld [vmem:[#allocation2 + $0x3c] sm:$0x1] }
 0x251   : > { %1905 = vrot.lane.b32.xlu1 %v1870_v6, %s2952_s21 }
 0x252   : > { %1951 = vrot.lane.b32.xlu0 %v1941_v35, %s2955_s24  ;;  %v1709_v35 = vld [vmem:[#allocation2 + $0x2c] sm:$0x1] }
 0x255   : > { %2269 = vrot.lane.b32.xlu1 %v2224_v33, %s2965_s8  ;;  %v1724_v33 = vld [vmem:[#allocation2 + $0x40] sm:$0xf] }
 0x256   : > { %2315 = vrot.lane.b32.xlu0 %v2307_v63, %s2968_s20 }
 0x257   : > { %v2823_v45 = vpop.f32.mrb[4].mxu0 }
 0x258   : > { %v1513_v43 = vmax.f32 %v2823_v45, 0.0  ;;  %v1492_v41 = vpop.f32.mrb[5].mxu0  ;;  %v1715_v45 = vld [vmem:[#allocation2 + $0x34] sm:$0x1] }
 0x259   : > { %v1511_v59 = vmax.f32 %v1492_v41, 0.0  ;;  %1901 = vrot.lane.b32.xlu1 %v1856_v54, %s2952_s21  ;;  %v2824_v0 = vpop.f32.mrb[6].mxu0 }
 0x25a   : > { %2087 = vrot.lane.b32.xlu0 %v2047_v8, %s2959_s28  ;;  %v2790_v29 = vpack.c.bf16 %v1513_v43, %v1513_v43  ;;  %v1514_v58 = vmax.f32 %v2824_v0, 0.0  ;;  %v1495_v25 = vpop.f32.mrb[7].mxu0  ;;  %v2037_v0 = vshll.u32 %v3938_v37, 16 }
 0x25b   : > { %v2788_v36 = vpack.c.bf16 %v1511_v59, %v1511_v59  ;;  %v1512_v46 = vmax.f32 %v1495_v25, 0.0 }
 0x25c   : > { %v1649_v32 = vshrl.u32 %v2790_v29, 16  ;;  %v2791_v22 = vpack.c.bf16 %v1514_v58, %v1514_v58  ;;  %v1652_v48 = vshll.u32 %v2790_v29, 16  ;;  %v1860_v29 = vshll.u32 %v3942_v39, 16 }
 0x25d   : > { %v1633_v30 = vshrl.u32 %v2788_v36, 16  ;;  %v2789_v24 = vpack.c.bf16 %v1512_v46, %v1512_v46  ;;  %2089 = vrot.lane.b32.xlu1 %v2054_v18, %s2959_s28  ;;  %v1636_v44 = vshll.u32 %v2788_v36, 16  ;;  %v2039_v52 = vrot.slane %v2037_v0, 1 }
 0x25e   : > { %2083 = vrot.lane.b32.xlu0 %v2033_v7, %s2959_s28  ;;  %v1651_v47 = vrot.slane %v1649_v32, 7  ;;  %v1657_v27 = vshrl.u32 %v2791_v22, 16  ;;  %v1660_v10 = vshll.u32 %v2791_v22, 16  ;;  %v1862_v13 = vrot.slane %v1860_v29, 1 }
 0x25f   : > { %v1635_v6 = vrot.slane %v1633_v30, 7  ;;  %v1641_v55 = vshrl.u32 %v2789_v24, 16  ;;  %v1644_v4 = vshll.u32 %v2789_v24, 16  ;;  %v2214_v36 = vshll.u32 %v2751_v51, 16 }
 0x260   : > { %v1654_v1 = vor.u32 %v1652_v48, %v1651_v47  ;;  %v1655_v23 = vrot.slane %v1651_v47, 4  ;;  %v1659_v57 = vrot.slane %v1657_v27, 7  ;;  %v2040_v46 = vor.u32 %v2039_v52, %v2035_v49 }
 0x261   : > { %v1638_v26 = vor.u32 %v1636_v44, %v1635_v6  ;;  %v1639_v63 = vrot.slane %v1635_v6, 4  ;;  %v1643_v21 = vrot.slane %v1641_v55, 7  ;;  %v1863_v7 = vor.u32 %v1862_v13, %v1858_v3 }
 0x262   : > { %2271 = vrot.lane.b32.xlu0 %v2231_v12, %s2965_s8  ;;  %v1719_v61 = vsel %vm3823_vm4, %v1654_v1, %v1718_v16  ;;  %v1722_v40 = vsel %vm3796_vm0, %v1655_v23, %v1721_v50  ;;  %v1662_v62 = vor.u32 %v1660_v10, %v1659_v57  ;;  %v1663_v34 = vrot.slane %v1659_v57, 4 }
 0x263   : > { %1720 = vst [vmem:[#allocation2 + $0x38] sm:$0xf] %v1719_v61  ;;  %1723 = vst [vmem:[#allocation2 + $0x3c] sm:$0x1] %v1722_v40  ;;  %v1707_v54 = vsel %vm3823_vm4, %v1638_v26, %v1706_v60  ;;  %v1710_v8 = vsel %vm3796_vm0, %v1639_v63, %v1709_v35  ;;  %v1646_v17 = vor.u32 %v1644_v4, %v1643_v21  ;;  %v1647_v5 = vrot.slane %v1643_v21, 4  ;;  %v2938_v21 = vld [vmem:[%s4205_s2] sm:$0xff]  }
 0x264   : > { %1708 = vst [vmem:[#allocation2 + $0x28] sm:$0xf] %v1707_v54  ;;  %1711 = vst [vmem:[#allocation2 + $0x2c] sm:$0x1] %v1710_v8  ;;  %v1725_v43 = vsel %vm3823_vm4, %v1662_v62, %v1724_v33  ;;  %v1728_v41 = vsel %vm3796_vm0, %v1663_v34, %v1727_v14  ;;  %v2216_v15 = vrot.slane %v2214_v36, 1  ;;  %v2212_v16 = vshrl.u32 %v2751_v51, 16  ;;  %2825 = vmatprep.subr.bf16.mxu1 %v2938_v21 }
 0x265   : > { %1726 = vst [vmem:[#allocation2 + $0x40] sm:$0xf] %v1725_v43  ;;  %1729 = vst [vmem:[#allocation2 + $0x44] sm:$0x1] %v1728_v41  ;;  %v1713_v31 = vsel %vm3823_vm4, %v1646_v17, %v1712_v2  ;;  %v1716_v59 = vsel %vm3796_vm0, %v1647_v5, %v1715_v45  ;;  %2826 = vmatpush3.bf16.msra.mxu1 %v2938_v21  ;;  %v2939_v45 = vld [vmem:[%s4205_s2 + $0x8] sm:$0xff]  }
 0x266   : > { %1907 = vrot.lane.b32.xlu0 %v1877_v28, %s2952_s21  ;;  %1714 = vst [vmem:[#allocation2 + $0x30] sm:$0xf] %v1713_v31  ;;  %1717 = vst [vmem:[#allocation2 + $0x34] sm:$0x1] %v1716_v59  ;;  %v2217_v50 = vor.u32 %v2216_v15, %v2212_v16  ;;  %2827 = vmatprep.subr.bf16.mxu1 %v2939_v45 }
 0x269   : > { %2828 = vmatpush3.bf16.msra.mxu1 %v2939_v45 }
 0x26a   : > { %v3968_v58 = vld [vmem:[#allocation2 + $0x38] sm:$0xf]  ;;  %v1745_v22 = vld [vmem:[#allocation2 + $0x3c] sm:$0x1] }
 0x26b   : > { %v3970_v25 = vld [vmem:[#allocation2 + $0x38] sm:$0xf]  ;;  %v2748_v38 = vcombine.low %v3968_v58, %v3968_v58  ;;  %v3980_v32 = vld [vmem:[#allocation2 + $0x28] sm:$0xf]  ;;  %v1768_v20 = vld [vmem:[#allocation2 + $0x3c] sm:$0x1] }
 0x26c   : > { %v2725_v18 = vcombine.low %v3970_v25, %v3970_v25  ;;  %v1753_v42 = vld [vmem:[#allocation2 + $0x38] sm:$0xe]  ;;  %v2746_v30 = vcombine.low %v3980_v32, %v3980_v32  ;;  %v1758_v37 = vld [vmem:[#allocation2 + $0x28] sm:$0xf]  ;;  %v3988_v27 = vld [vmem:[#allocation2 + $0x40] sm:$0xf]  ;;  %v2733_v43 = vcombine.low %v3970_v25, %v1768_v20 }
 0x26d   : > { %2181 = vrot.lane.b32.xlu1 %v2748_v38, %s2963_s6  ;;  %v2718_v24 = vcombine.low %v1753_v42, %v1745_v22  ;;  %v1776_v39 = vld [vmem:[#allocation2 + $0x38] sm:$0xe]  ;;  %v2723_v48 = vcombine.low %v1758_v37, %v1758_v37  ;;  %v3990_v12 = vld [vmem:[#allocation2 + $0x2c] sm:$0x1]  ;;  %v1798_v6 = vld [vmem:[#allocation2 + $0x28] sm:$0xe]  ;;  %v2726_v35 = vcombine.low %v3988_v27, %v3988_v27 }
 0x26e   : > { %1999 = vrot.lane.b32.xlu0 %v2725_v18, %s2957_s26  ;;  %v2741_v60 = vcombine.low %v1776_v39, %v1768_v20  ;;  %v2762_v55 = vcombine.low %v1798_v6, %v3990_v12  ;;  %v1766_v28 = vld [vmem:[#allocation2 + $0x2c] sm:$0x1]  ;;  %v1774_v1 = vld [vmem:[#allocation2 + $0x28] sm:$0xe]  ;;  %v1785_v23 = vld [vmem:[#allocation2 + $0x40] sm:$0xf] }
 0x26f   : > { %v1946_v47 = vrot.slane %v2718_v24, 1  ;;  %v3997_v57 = vld [vmem:[#allocation2 + $0x2c] sm:$0x1]  ;;  %v1751_v10 = vld [vmem:[#allocation2 + $0x28] sm:$0xe]  ;;  %v2739_v33 = vcombine.low %v1774_v1, %v1766_v28  ;;  %v2749_v26 = vcombine.low %v1785_v23, %v1785_v23  ;;  %v2940_v25 = vld [vmem:[%s4205_s2 + $0x10] sm:$0xff]   ;;  %v2731_v36 = vcombine.low %v1758_v37, %v1766_v28 }
 0x270   : > { %v2129_v44 = vrot.slane %v2741_v60, 1  ;;  %v2310_v63 = vrot.slane %v2762_v55, 1  ;;  %v2716_v14 = vcombine.low %v1751_v10, %v3997_v57  ;;  %v4007_v4 = vld [vmem:[#allocation2 + $0x38] sm:$0xf]  ;;  %v4009_v40 = vld [vmem:[#allocation2 + $0x30] sm:$0xf]  ;;  %2829 = vmatprep.subr.bf16.mxu1 %v2940_v25 }
 0x271   : > { %2085 = vrot.lane.b32.xlu1 %v2040_v46, %s2959_s28  ;;  %v2127_v61 = vrot.slane %v2739_v33, 1  ;;  %v4011_v34 = vld [vmem:[#allocation2 + $0x30] sm:$0xf]  ;;  %v4013_v2 = vld [vmem:[#allocation2 + $0x44] sm:$0x1]  ;;  %v2710_v5 = vcombine.low %v4007_v4, %v1745_v22  ;;  %v2747_v31 = vcombine.low %v4009_v40, %v4009_v40  ;;  %v2072_v42 = vshll.u32 %v2733_v43, 16  ;;  %2830 = vmatpush3.bf16.msra.mxu1 %v2940_v25 }
 0x272   : > { %1903 = vrot.lane.b32.xlu0 %v1863_v7, %s2952_s21  ;;  %v1944_v62 = vrot.slane %v2716_v14, 1  ;;  %v1777_v54 = vld [vmem:[#allocation2 + $0x40] sm:$0xe]  ;;  %v1744_v8 = vld [vmem:[#allocation2 + $0x34] sm:$0x1]  ;;  %v2724_v59 = vcombine.low %v4011_v34, %v4011_v34  ;;  %v2058_v60 = vshll.u32 %v2731_v36, 16  ;;  %v2734_v14 = vcombine.low %v3988_v27, %v4013_v2 }
 0x273   : > { %v1752_v17 = vld [vmem:[#allocation2 + $0x30] sm:$0xe]  ;;  %v4022_v41 = vld [vmem:[#allocation2 + $0x3c] sm:$0x1]  ;;  %v2742_v0 = vcombine.low %v1777_v54, %v4013_v2  ;;  %v4029_v29 = vld [vmem:[#allocation2 + $0x34] sm:$0x1] }
 0x274   : > { %v2717_v51 = vcombine.low %v1752_v17, %v1744_v8  ;;  %v1775_v52 = vld [vmem:[#allocation2 + $0x30] sm:$0xe]  ;;  %v1791_v38 = vld [vmem:[#allocation2 + $0x34] sm:$0x1]  ;;  %v2756_v13 = vcombine.low %v3968_v58, %v4022_v41  ;;  %v1895_v3 = vshll.u32 %v2710_v5, 16  ;;  %v2941_v58 = vld [vmem:[%s4205_s2 + $0x18] sm:$0xff]   ;;  %v4068_v17 = vpop.permute.xlu0 %1899  ;;  %v2732_v27 = vcombine.low %v4011_v34, %v4029_v29 }
 0x275   : > { %2177 = vrot.lane.b32.xlu1 %v2746_v30, %s2963_s6  ;;  %v1799_v18 = vld [vmem:[#allocation2 + $0x30] sm:$0xe]  ;;  %v2740_v49 = vcombine.low %v1775_v52, %v4029_v29  ;;  %v4039_v46 = vld [vmem:[#allocation2 + $0x44] sm:$0x1]  ;;  %v2130_v7 = vrot.slane %v2742_v0, 1  ;;  %2831 = vmatprep.subr.bf16.mxu1 %v2941_v58  ;;  %v1893_v6 = vshrl.u32 %v2710_v5, 16  ;;  %v2755_v21 = vcombine.low %v4009_v40, %v1791_v38 }
 0x276   : > { %2267 = vrot.lane.b32.xlu0 %v2217_v50, %s2965_s8  ;;  %v1945_v15 = vrot.slane %v2717_v51, 1  ;;  %v2763_v22 = vcombine.low %v1799_v18, %v1791_v38  ;;  %v2757_v16 = vcombine.low %v1785_v23, %v4039_v46  ;;  %v2754_v50 = vcombine.low %v3980_v32, %v3990_v12  ;;  %v4049_v30 = vld [vmem:[#allocation2 + $0x28] sm:$0xf]  ;;  %v4051_v20 = vld [vmem:[#allocation2 + $0x30] sm:$0xf]  ;;  %2832 = vmatpush3.bf16.msra.mxu1 %v2941_v58 }
 0x277   : > { %v2128_v24 = vrot.slane %v2740_v49, 1  ;;  %v1897_v37 = vrot.slane %v1895_v3, 1  ;;  %v2070_v32 = vshrl.u32 %v2733_v43, 16  ;;  %v2709_v12 = vcombine.low %v4051_v20, %v1744_v8  ;;  %v2942_v28 = vld [vmem:[%s4205_s2 + $0x20] ss:$0 sps:$4 sm:$0xff]   ;;  %v4066_v8 = vpop.permute.xlu1 %2185 }
 0x278   : > { %v2311_v39 = vrot.slane %v2763_v22, 1  ;;  %v2235_v55 = vshll.u32 %v2754_v50, 16  ;;  %v2060_v10 = vrot.slane %v2058_v60, 1  ;;  %v2256_v33 = vshll.u32 %v2757_v16, 16  ;;  %2843 = vmatprep.subr.msk.bf16.mxu1 %vm2543_vm6, %v2942_v28  ;;  %v1802_v60 = vld [vmem:[#allocation2 + $0x48] sm:$0xe] }
 0x279   : > { %1961 = vrot.lane.b32.xlu1 %v1946_v47, %s2955_s24  ;;  %v2074_v47 = vrot.slane %v2072_v42, 1  ;;  %v1888_v43 = vshll.u32 %v2709_v12, 16  ;;  %v2079_v52 = vshll.u32 %v2734_v14, 16  ;;  %v2242_v38 = vshll.u32 %v2755_v21, 16 }
 0x27a   : > { %1995 = vrot.lane.b32.xlu0 %v2723_v48, %s2957_s26  ;;  %v2249_v48 = vshll.u32 %v2756_v13, 16  ;;  %v2258_v5 = vrot.slane %v2256_v33, 1  ;;  %v2065_v29 = vshll.u32 %v2732_v27, 16  ;;  %v2077_v22 = vshrl.u32 %v2734_v14, 16 }
 0x27b   : > { %v2075_v1 = vor.u32 %v2074_v47, %v2070_v32  ;;  %v1890_v51 = vrot.slane %v1888_v43, 1  ;;  %v4076_v25 = vpop.permute.xlu1 %2281  ;;  %v2244_v34 = vrot.slane %v2242_v38, 1  ;;  %v2240_v42 = vshrl.u32 %v2755_v21, 16  ;;  %v1800_v47 = vld [vmem:[#allocation2 + $0x38] sm:$0xe] }
 0x27c   : > { %v2251_v23 = vrot.slane %v2249_v48, 1  ;;  %v2063_v48 = vshrl.u32 %v2732_v27, 16 }
 0x27d   : > { %2001 = vrot.lane.b32.xlu1 %v2726_v35, %s2957_s26  ;;  %v1898_v35 = vor.u32 %v1897_v37, %v1893_v6  ;;  %v2067_v37 = vrot.slane %v2065_v29, 1 }
 0x27e   : > { %2143 = vrot.lane.b32.xlu0 %v2129_v44, %s2961_s30  ;;  %v2708_v44 = vcombine.low %v4049_v30, %v3997_v57  ;;  %v2545_v57 = vsel %vm2543_vm6, %v2942_v28, 0 }
 0x27f   : > { %2834 = vmatpush3.bf16.msra.mxu1 %v2545_v57  ;;  %v2068_v32 = vor.u32 %v2067_v37, %v2063_v48 }
 0x280   : > { %v1879_v18 = vshrl.u32 %v2708_v44, 16 }
 0x281   : > { %2321 = vrot.lane.b32.xlu1 %v2310_v63, %s2968_s20  ;;  %v2056_v63 = vshrl.u32 %v2731_v36, 16  ;;  %v1886_v36 = vshrl.u32 %v2709_v12, 16 }
 0x282   : > { %2183 = vrot.lane.b32.xlu0 %v2749_v26, %s2963_s6  ;;  %v2247_v26 = vshrl.u32 %v2756_v13, 16  ;;  %v4078_v13 = vpop.permute.xlu0 %1947 }
 0x283   : > { %v2061_v54 = vor.u32 %v2060_v10, %v2056_v63  ;;  %v1891_v3 = vor.u32 %v1890_v51, %v1886_v36 }
 0x284   : > { %v2252_v45 = vor.u32 %v2251_v23, %v2247_v26 }
 0x285   : > { %1957 = vrot.lane.b32.xlu1 %v1944_v62, %s2955_s24  ;;  %v1881_v62 = vshll.u32 %v2708_v44, 16 }
 0x286   : > { %2139 = vrot.lane.b32.xlu0 %v2127_v61, %s2961_s30  ;;  %v2237_v61 = vrot.slane %v2235_v55, 1  ;;  %v2766_v55 = vcombine.low %v1802_v60, %v3827_v9 }
 0x287   : > { %v1883_v2 = vrot.slane %v1881_v62, 1 }
 0x288   : > { %v2314_v23 = vrot.slane %v2766_v55, 1 }
 0x289   : > { %1997 = vrot.lane.b32.xlu1 %v2724_v59, %s2957_s26  ;;  %v2254_v59 = vshrl.u32 %v2757_v16, 16  ;;  %v1884_v49 = vor.u32 %v1883_v2, %v1879_v18  ;;  %v2943_v18 = vld [vmem:[#allocation2] sm:$0xf] }
 0x28a   : > { %2179 = vrot.lane.b32.xlu0 %v2747_v31, %s2963_s6  ;;  %v2233_v31 = vshrl.u32 %v2754_v50, 16  ;;  %v2333_v36 = vsel %vm1139_vm10, %v2943_v18, %v4068_v17 }
 0x28b   : > { %v2259_v0 = vor.u32 %v2258_v5, %v2254_v59 }
 0x28c   : > { %v2238_v40 = vor.u32 %v2237_v61, %v2233_v31 }
 0x28d   : > { %2145 = vrot.lane.b32.xlu1 %v2130_v7, %s2961_s30  ;;  %v2081_v7 = vrot.slane %v2079_v52, 1 }
 0x28e   : > { %1959 = vrot.lane.b32.xlu0 %v1945_v15, %s2955_s24  ;;  %v1801_v15 = vld [vmem:[#allocation2 + $0x40] sm:$0xe] }
 0x28f   : > { %v2082_v50 = vor.u32 %v2081_v7, %v2077_v22 }
 0x291   : > { %2141 = vrot.lane.b32.xlu1 %v2128_v24, %s2961_s30  ;;  %v2245_v24 = vor.u32 %v2244_v34, %v2240_v42 }
 0x292   : > { %2323 = vrot.lane.b32.xlu0 %v2311_v39, %s2968_s20  ;;  %v2765_v39 = vcombine.low %v1801_v15, %v4039_v46 }
 0x294   : > { %v2313_v12 = vrot.slane %v2765_v39, 1 }
 0x295   : > { %1913 = vrot.lane.b32.xlu1 %v1898_v35, %s2952_s21  ;;  %v2764_v35 = vcombine.low %v1800_v47, %v4022_v41 }
 0x296   : > { %2095 = vrot.lane.b32.xlu0 %v2075_v1, %s2959_s28 }
 0x297   : > { %v2312_v1 = vrot.slane %v2764_v35, 1 }
 0x299   : > { %2277 = vrot.lane.b32.xlu1 %v2252_v45, %s2965_s8 }
 0x29a   : > { %2091 = vrot.lane.b32.xlu0 %v2061_v54, %s2959_s28 }
 0x29d   : > { %2273 = vrot.lane.b32.xlu1 %v2238_v40, %s2965_s8 }
 0x29e   : > { %2279 = vrot.lane.b32.xlu0 %v2259_v0, %s2965_s8 }
 0x2a1   : > { %1909 = vrot.lane.b32.xlu1 %v1884_v49, %s2952_s21  ;;  %v2356_v49 = vsel %vm1173_vm11, %v2333_v36, %v4078_v13 }
 0x2a2   : > { %1911 = vrot.lane.b32.xlu0 %v1891_v3, %s2952_s21  ;;  %s2783_s21 = sshll.u32 %s4271_s16, 6 }
 0x2a3   : > { %v4082_v58 = vpop.permute.xlu1 %2173  ;;  %s197_s10 = scalar_lea.vmem %s4207_s4, %s2783_s21 }
 0x2a4   : > { %v4084_v16 = vpop.permute.xlu0 %1991 }
 0x2a5   : > { %2097 = vrot.lane.b32.xlu1 %v2082_v50, %s2959_s28 }
 0x2a6   : > { %2275 = vrot.lane.b32.xlu0 %v2245_v24, %s2965_s8 }
 0x2a7   : > { %v1954_v6 = vpop.permute.xlu1 %1953 }
 0x2a8   : > { %v1988_v44 = vpop.permute.xlu0 %1987 }
 0x2a9   : > { %2093 = vrot.lane.b32.xlu1 %v2068_v32, %s2959_s28  ;;  %v2372_v29 = vsel %vm1207_vm13, %v2356_v49, %v1988_v44 }
 0x2aa   : > { %2327 = vrot.lane.b32.xlu0 %v2313_v12, %s2968_s20 }
 0x2ab   : > { %v1994_v46 = vpop.permute.xlu1 %1993 }
 0x2ac   : > { %v2136_v28 = vpop.permute.xlu0 %2135 }
 0x2ad   : > { %2325 = vrot.lane.b32.xlu1 %v2312_v1, %s2968_s20 }
 0x2af   : > { %v2318_v10 = vpop.permute.xlu1 %2317 }
 0x2b0   : > { %v2176_v33 = vpop.permute.xlu0 %2175 }
 0x2b1   : > { %2329 = vrot.lane.b32.xlu1 %v2314_v23, %s2968_s20 }
 0x2b3   : > { %v1950_v57 = vpop.permute.xlu1 %1949 }
 0x2b4   : > { %v2132_v26 = vpop.permute.xlu0 %2131 }
 0x2b7   : > { %v1990_v63 = vpop.permute.xlu1 %1989 }
 0x2b8   : > { %v2172_v41 = vpop.permute.xlu0 %2171 }
 0x2bb   : > { %v2138_v14 = vpop.permute.xlu1 %2137 }
 0x2bc   : > { %v2320_v21 = vpop.permute.xlu0 %2319 }
 0x2bf   : > { %v2134_v61 = vpop.permute.xlu1 %2133 }
 0x2c0   : > { %v4095_v62 = vpop.permute.xlu0 %1955 }
 0x2c3   : > { %v1906_v9 = vpop.permute.xlu1 %1905 }
 0x2c4   : > { %v1952_v45 = vpop.permute.xlu0 %1951  ;;  %v2342_v54 = vsel %vm1139_vm10, %v3890_v19, %v1906_v9 }
 0x2c5   : > { %v2362_v5 = vsel %vm1173_vm11, %v2342_v54, %v1954_v6 }
 0x2c6   : > { %v2378_v43 = vsel %vm1207_vm13, %v2362_v5, %v1994_v46 }
 0x2c7   : > { %v2270_v31 = vpop.permute.xlu1 %2269 }
 0x2c8   : > { %v2316_v59 = vpop.permute.xlu0 %2315 }
 0x2cb   : > { %v1902_v27 = vpop.permute.xlu1 %1901 }
 0x2cc   : > { %v2088_v40 = vpop.permute.xlu0 %2087  ;;  %v2336_v3 = vsel %vm1139_vm10, %v3908_v11, %v1902_v27 }
 0x2cd   : > { %v2358_v15 = vsel %vm1173_vm11, %v2336_v3, %v1950_v57 }
 0x2ce   : > { %v2374_v42 = vsel %vm1207_vm13, %v2358_v15, %v1990_v63 }
 0x2cf   : > { %v2090_v2 = vpop.permute.xlu1 %2089 }
 0x2d0   : > { %v2084_v0 = vpop.permute.xlu0 %2083  ;;  %v2394_v51 = vsel %vm1241_vm15, %v2378_v43, %v2090_v2 }
 0x2d1   : > { %v2410_v52 = vsel %vm1275_vm1, %v2394_v51, %v2138_v14  ;;  %v2388_v22 = vsel %vm1241_vm15, %v2372_v29, %v2084_v0 }
 0x2d2   : > { %v2404_v24 = vsel %vm1275_vm1, %v2388_v22, %v2132_v26 }
 0x2d3   : > { %v2420_v44 = vsel %vm1309_vm3, %v2404_v24, %v2172_v41 }
 0x2d4   : > { %v2272_v38 = vpop.permute.xlu0 %2271 }
 0x2d8   : > { %v1908_v19 = vpop.permute.xlu0 %1907 }
 0x2df   : > { %v4109_v7 = vpop.permute.xlu1 %2181 }
 0x2e0   : > { %v4111_v34 = vpop.permute.xlu0 %1999 }
 0x2e3   : > { %v2086_v17 = vpop.permute.xlu1 %2085 }
 0x2e4   : > { %v1904_v50 = vpop.permute.xlu0 %1903  ;;  %v2390_v13 = vsel %vm1241_vm15, %v2374_v42, %v2086_v17 }
 0x2e5   : > { %v2339_v11 = vsel %vm1139_vm10, %v3934_v53, %v1904_v50  ;;  %v2406_v37 = vsel %vm1275_vm1, %v2390_v13, %v2134_v61 }
 0x2e6   : > { %v2360_v39 = vsel %vm1173_vm11, %v2339_v11, %v1952_v45  ;;  %v2422_v47 = vsel %vm1309_vm3, %v2406_v37, %v4082_v58 }
 0x2e7   : > { %v2376_v48 = vsel %vm1207_vm13, %v2360_v39, %v4084_v16  ;;  %v2178_v6 = vpop.permute.xlu1 %2177  ;;  %v2438_v12 = vsel %vm1343_vm5, %v2422_v47, %v2270_v31 }
 0x2e8   : > { %v2392_v60 = vsel %vm1241_vm15, %v2376_v48, %v2088_v40  ;;  %v2268_v32 = vpop.permute.xlu0 %2267  ;;  %v2454_v55 = vsel %vm1429_vm7, %v2438_v12, %v2318_v10 }
 0x2e9   : > { %v2408_v53 = vsel %vm1275_vm1, %v2392_v60, %v2136_v28  ;;  %v2436_v35 = vsel %vm1343_vm5, %v2420_v44, %v2268_v32 }
 0x2ea   : > { %v2452_v46 = vsel %vm1429_vm7, %v2436_v35, %v2316_v59  ;;  %v2424_v58 = vsel %vm1309_vm3, %v2408_v53, %v2176_v33 }
 0x2eb   : > { %v2768_v16 = vcombine.low %v2452_v46, %v2454_v55  ;;  %v2440_v1 = vsel %vm1343_vm5, %v2424_v58, %v2272_v38  ;;  %v1962_v23 = vpop.permute.xlu1 %1961  ;;  %v2345_v38 = vsel %vm1139_vm10, %v3923_v56, %v1908_v19 }
 0x2ec   : > { %v1996_v57 = vpop.permute.xlu0 %1995  ;;  %v2456_v26 = vsel %vm1429_vm7, %v2440_v1, %v2320_v21  ;;  %v2426_v21 = vsel %vm1309_vm3, %v2410_v52, %v2178_v6  ;;  %v2364_v15 = vsel %vm1173_vm11, %v2345_v38, %v4095_v62 }
 0x2ed   : > { %2835 = vmatprep.mubr.msk.bf16.mxu1 %vm2530_vm8, %v2768_v16  ;;  %v2380_v22 = vsel %vm1207_vm13, %v2364_v15, %v1996_v57 }
 0x2ef   : > { %v2002_v63 = vpop.permute.xlu1 %2001 }
 0x2f0   : > { %v2144_v28 = vpop.permute.xlu0 %2143 }
 0x2f3   : > { %v2322_v41 = vpop.permute.xlu1 %2321 }
 0x2f4   : > { %v2184_v14 = vpop.permute.xlu0 %2183 }
 0x2f7   : > { %v1958_v61 = vpop.permute.xlu1 %1957 }
 0x2f8   : > { %v2140_v10 = vpop.permute.xlu0 %2139 }
 0x2fb   : > { %v1998_v9 = vpop.permute.xlu1 %1997 }
 0x2fc   : > { %v2180_v45 = vpop.permute.xlu0 %2179 }
 0x2ff   : > { %v2146_v54 = vpop.permute.xlu1 %2145 }
 0x300   : > { %v1960_v5 = vpop.permute.xlu0 %1959 }
 0x303   : > { %v2142_v33 = vpop.permute.xlu1 %2141 }
 0x304   : > { %v2324_v43 = vpop.permute.xlu0 %2323 }
 0x307   : > { %v1914_v31 = vpop.permute.xlu1 %1913 }
 0x308   : > { %v2096_v59 = vpop.permute.xlu0 %2095  ;;  %v2354_v49 = vsel %vm1139_vm10, %v4007_v4, %v1914_v31 }
 0x309   : > { %v2370_v42 = vsel %vm1173_vm11, %v2354_v49, %v1962_v23 }
 0x30a   : > { %v2386_v13 = vsel %vm1207_vm13, %v2370_v42, %v2002_v63 }
 0x30b   : > { %v2278_v27 = vpop.permute.xlu1 %2277 }
 0x30c   : > { %v2092_v40 = vpop.permute.xlu0 %2091 }
 0x30d   : > { %v2396_v4 = vsel %vm1241_vm15, %v2380_v22, %v2092_v40 }
 0x30e   : > { %v2412_v24 = vsel %vm1275_vm1, %v2396_v4, %v2140_v10 }
 0x30f   : > { %v2274_v2 = vpop.permute.xlu1 %2273  ;;  %v2428_v48 = vsel %vm1309_vm3, %v2412_v24, %v2180_v45 }
 0x310   : > { %v2280_v0 = vpop.permute.xlu0 %2279  ;;  %v2442_v51 = vsel %vm1343_vm5, %v2426_v21, %v2274_v2 }
 0x311   : > { %v2458_v18 = vsel %vm1429_vm7, %v2442_v51, %v2322_v41 }
 0x312   : > { %v2769_v36 = vcombine.low %v2456_v26, %v2458_v18 }
 0x313   : > { %v1910_v3 = vpop.permute.xlu1 %1909 }
 0x314   : > { %v1912_v29 = vpop.permute.xlu0 %1911  ;;  %2836 = vmatmul.mubr.msk.bf16.vlgmr.msra.gmra.mrb[0].mxu1 %vm2530_vm8, %v2769_v36  ;;  %v2348_v56 = vsel %vm1139_vm10, %v4049_v30, %v1910_v3 }
 0x315   : > { %v2351_v52 = vsel %vm1139_vm10, %v4051_v20, %v1912_v29  ;;  %v2366_v50 = vsel %vm1173_vm11, %v2348_v56, %v1958_v61 }
 0x316   : > { %v2368_v19 = vsel %vm1173_vm11, %v2351_v52, %v1960_v5  ;;  %v2382_v37 = vsel %vm1207_vm13, %v2366_v50, %v1998_v9 }
 0x317   : > { %v2384_v17 = vsel %vm1207_vm13, %v2368_v19, %v4111_v34  ;;  %v2098_v62 = vpop.permute.xlu1 %2097 }
 0x318   : > { %v2400_v20 = vsel %vm1241_vm15, %v2384_v17, %v2096_v59  ;;  %v2402_v30 = vsel %vm1241_vm15, %v2386_v13, %v2098_v62  ;;  %v2276_v11 = vpop.permute.xlu0 %2275 }
 0x319   : > { %v2416_v47 = vsel %vm1275_vm1, %v2400_v20, %v2144_v28  ;;  %v2418_v60 = vsel %vm1275_vm1, %v2402_v30, %v2146_v54  ;;  %v2444_v6 = vsel %vm1343_vm5, %v2428_v48, %v2276_v11 }
 0x31a   : > { %v2432_v32 = vsel %vm1309_vm3, %v2416_v47, %v2184_v14  ;;  %v2460_v55 = vsel %vm1429_vm7, %v2444_v6, %v2324_v43  ;;  %v2434_v58 = vsel %vm1309_vm3, %v2418_v60, %v4066_v8  ;;  %v2767_v8 = vld [vmem:[%s4206_s3] ss:$0 sm:$0xff] }
 0x31b   : > { %v2094_v39 = vpop.permute.xlu1 %2093  ;;  %v2448_v16 = vsel %vm1343_vm5, %v2432_v32, %v2280_v0  ;;  %v2450_v57 = vsel %vm1343_vm5, %v2434_v58, %v4076_v25 }
 0x31c   : > { %v2398_v34 = vsel %vm1241_vm15, %v2382_v37, %v2094_v39  ;;  %v2328_v1 = vpop.permute.xlu0 %2327 }
 0x31d   : > { %v2414_v44 = vsel %vm1275_vm1, %v2398_v34, %v2142_v33 }
 0x31e   : > { %v2430_v12 = vsel %vm1309_vm3, %v2414_v44, %v4109_v7  ;;  %v2464_v7 = vsel %vm1429_vm7, %v2448_v16, %v2328_v1 }
 0x31f   : > { %v2446_v53 = vsel %vm1343_vm5, %v2430_v12, %v2278_v27  ;;  %v2326_v35 = vpop.permute.xlu1 %2325 }
 0x320   : > { %v2462_v46 = vsel %vm1429_vm7, %v2446_v53, %v2326_v35 }
 0x321   : > { %v2770_v23 = vcombine.low %v2460_v55, %v2462_v46 }
 0x323   : > { %v2330_v26 = vpop.permute.xlu1 %2329  ;;  %2839 = vmatprep.mubr.msk.bf16.mxu1 %vm2530_vm8, %v2770_v23 }
 0x324   : > { %v2466_v63 = vsel %vm1429_vm7, %v2450_v57, %v2330_v26 }
 0x325   : > { %v2771_v28 = vcombine.low %v2464_v7, %v2466_v63 }
 0x327   : > { %2840 = vmatmul.mubr.msk.bf16.gmra.mrb[4].mxu1 %vm2530_vm8, %v2771_v28 }
 0x3e7   : > { %v2837_v25 = vpop.f32.mrb[0].mxu1 }
 0x3e8   : > { %v2590_v41 = vadd.f32 %v2837_v25, %v2767_v8  ;;  %v2581_v14 = vpop.f32.mrb[1].mxu1 }
 0x3e9   : > { %v2582_v61 = vadd.f32 %v2767_v8, %v2581_v14  ;;  %v2838_v10 = vpop.f32.mrb[2].mxu1 }
 0x3ea   : > { %2614 = vst.msk [vmem:[%s197_s10 + $0x10] sm:$0xff] %vm1173_vm11, %v2590_v41  ;;  %v2593_v9 = vadd.f32 %v2838_v10, %v2767_v8  ;;  %v2584_v45 = vpop.f32.mrb[3].mxu1 }
 0x3eb   : > { %2612 = vst.msk [vmem:[%s197_s10] sm:$0xff] %vm1173_vm11, %v2582_v61  ;;  %v2585_v54 = vadd.f32 %v2767_v8, %v2584_v45 }
 0x3ec   : > { %2615 = vst.msk [vmem:[%s197_s10 + $0x18] sm:$0xff] %vm1173_vm11, %v2593_v9 }
 0x3ed   : > { %2613 = vst.msk [vmem:[%s197_s10 + $0x8] sm:$0xff] %vm1173_vm11, %v2585_v54 }
 0x3fa   : > { %v2841_v5 = vpop.f32.mrb[4].mxu1 }
 0x3fb   : > { %v2606_v33 = vadd.f32 %v2841_v5, %v2767_v8  ;;  %v2597_v43 = vpop.f32.mrb[5].mxu1 }
 0x3fc   : > { %v2598_v31 = vadd.f32 %v2767_v8, %v2597_v43  ;;  %v2842_v59 = vpop.f32.mrb[6].mxu1 }
 0x3fd   : > { %2618 = vst.msk [vmem:[%s197_s10 + $0x30] sm:$0xff] %vm1173_vm11, %v2606_v33  ;;  %v2609_v27 = vadd.f32 %v2842_v59, %v2767_v8  ;;  %v2600_v40 = vpop.f32.mrb[7].mxu1 }
 0x3fe   : > { %2616 = vst.msk [vmem:[%s197_s10 + $0x20] sm:$0xff] %vm1173_vm11, %v2598_v31  ;;  %v2601_v21 = vadd.f32 %v2767_v8, %v2600_v40 }
 0x3ff   : > { %2619 = vst.msk [vmem:[%s197_s10 + $0x38] sm:$0xff] %vm1173_vm11, %v2609_v27 }
 0x400   : > { %2617 = vst.msk [vmem:[%s197_s10 + $0x28] sm:$0xff] %vm1173_vm11, %v2601_v21 }
 0x401 PF: > { %s14_s15 = sadd.s32 1, %s2950_s15  }
 0x402   : > { %p11_p4 = scmp.ge.s32.totalorder %s14_s15, 4  }
 0x404   :  { %13 = sbr.rel (!%p11_p4) target bundleno = 1 (0x1), region = 69 }

</bundles_post_ra>
